<compile_context>
chip_gen: v5e
topology: v5e:2x2
jax: 0.10.0
libtpu: 0.0.40
codegen_flags: <defaults>
</compile_context>

<pallas_src>
import jax
import jax.numpy as jnp
from jax.experimental import pallas as pl
from jax.experimental.pallas import tpu as pltpu


# ----------------------------------------------------------------------------
# Kernel body
# ----------------------------------------------------------------------------
def _make_classifier_kernel(training: bool):
    def kernel(x_conv_ref,        # [TB, S, C]  NHWC-flattened conv features
               x_t_ref,           # [TB, E]     transformer token
               wbs_ref, bb_ref,   # bottleneck   : [C, 256] (pre-scaled 1/S), [1, 256]
               wc_ref,  bc_ref,   # cls_head     : [256, NCP] (lane-padded),  [1, NCP]
               wbt_ref, bbt_ref,  # bottleneck_t : [E, 256],                  [1, 256]
               *out_refs):
        conv_cls_ref, tran_cls_ref = out_refs[0], out_refs[1]

        # AdaptiveAvgPool2d(1) + flatten(1): sublane-axis sum in f32.  The 1/S
        # scale is folded into wbs, and the [TB, C] result is already in the
        # layout the bottleneck matmul wants (C on lanes).
        pooled = jnp.sum(x_conv_ref[...].astype(jnp.float32), axis=1)          # [TB, C]

        wbs = wbs_ref[...]
        xp = jnp.dot(pooled.astype(wbs.dtype), wbs,
                     preferred_element_type=jnp.float32) + bb_ref[...]          # [TB, 256]
        wbt = wbt_ref[...]
        xt = jnp.dot(x_t_ref[...].astype(wbt.dtype), wbt,
                     preferred_element_type=jnp.float32) + bbt_ref[...]         # [TB, 256]

        # Shared cls_head: two independent MXU dots, stores are lane-dense.
        wc = wc_ref[...]
        bc = bc_ref[...]
        conv_cls_ref[...] = (jnp.dot(xp.astype(wc.dtype), wc,
                                     preferred_element_type=jnp.float32)
                             + bc).astype(conv_cls_ref.dtype)
        tran_cls_ref[...] = (jnp.dot(xt.astype(wc.dtype), wc,
                                     preferred_element_type=jnp.float32)
                             + bc).astype(tran_cls_ref.dtype)

        if training:
            out_refs[2][...] = xp.astype(out_refs[2].dtype)
            out_refs[3][...] = xt.astype(out_refs[3].dtype)

    return kernel


# ----------------------------------------------------------------------------
# VMEM accounting (padding- and generation-aware)
# ----------------------------------------------------------------------------
def _roundup(x: int, m: int) -> int:
    return ((x + m - 1) // m) * m


def _padded_block_bytes(shape, dtype) -> int:
    """Bytes a VMEM block actually occupies: last dim padded to 128 lanes,
    second-last padded to the dtype's sublane tile (8 for f32, 16 for bf16)."""
    itemsize = jnp.dtype(dtype).itemsize
    sub = max(8, 32 // itemsize)
    dims = [int(d) for d in shape]
    dims[-1] = _roundup(dims[-1], 128)
    if len(dims) >= 2:
        dims[-2] = _roundup(dims[-2], sub)
    n = 1
    for d in dims:
        n *= d
    return n * itemsize


def _tpu_vmem_capacity_bytes(default: int = 64 * 1024 * 1024) -> int:
    """Per-core VMEM capacity (64 MiB on v7x, 128 MiB on v5e/v6e)."""
    try:
        info = pltpu.get_tpu_info()
        return int(getattr(info, "vmem_capacity_bytes", default))
    except Exception:
        return default


def _pick_batch_tile(batch: int, footprint_fn, conv_block_fn,
                     budget: int, per_buffer_cap: int) -> int:
    """Largest batch tile that (a) divides B, (b) is a multiple of 8 (sublane)
    or the full batch, (c) keeps the *padded, multi-buffered* VMEM footprint
    under `budget` and the conv block under `per_buffer_cap`.  Prefers >= 2
    grid tiles (both TensorCores on v7x) and 16-row multiples (bf16 packing)."""
    cands = [d for d in range(1, batch + 1)
             if batch % d == 0 and (d % 8 == 0 or d == batch)]
    fitting = [d for d in cands
               if footprint_fn(d) <= budget and conv_block_fn(d) <= per_buffer_cap]
    if not fitting:
        fitting = [min(cands)]          # smallest legal tile; best we can do
    multi = [d for d in fitting if batch // d >= 2]
    pool = multi if multi else fitting
    m16 = [d for d in pool if d % 16 == 0]
    pool = m16 if m16 else pool
    return max(pool)


# ----------------------------------------------------------------------------
# Module wrapper
# ----------------------------------------------------------------------------
class ClassifierV1Pallas:
    """JAX/Pallas equivalent of Classifier_v1 (post-backbone heads)."""

    def __init__(self, key, num_classes: int, embed_dim: int,
                 channel_ratio: int = 4, stream_dtype=jnp.bfloat16):
        self.num_classes = num_classes
        self.embed_dim = embed_dim
        self.conv_channels = int(256 * channel_ratio)
        self.stream_dtype = jnp.dtype(stream_dtype)
        self.nc_pad = _roundup(num_classes, 128)     # lane-dense logit stores

        k = jax.random.split(key, 6)
        scale = 0.02
        # f32 master weights, stored transposed ([in, out]) vs nn.Linear.
        self.wb = scale * jax.random.normal(k[0], (self.conv_channels, 256), jnp.float32)
        self.bb = scale * jax.random.normal(k[1], (1, 256), jnp.float32)
        self.wc = scale * jax.random.normal(k[2], (256, num_classes), jnp.float32)
        self.bc = scale * jax.random.normal(k[3], (1, num_classes), jnp.float32)
        self.wbt = scale * jax.random.normal(k[4], (embed_dim, 256), jnp.float32)
        self.bbt = scale * jax.random.normal(k[5], (1, 256), jnp.float32)

        pad = self.nc_pad - num_classes
        self.wc_pad = jnp.pad(self.wc, ((0, 0), (0, pad)))
        self.bc_pad = jnp.pad(self.bc, ((0, 0), (0, pad)))

        # Streaming copies (bf16 by default); biases stay f32 (added post-MXU).
        self.wc_s = self.wc_pad.astype(self.stream_dtype)
        self.wbt_s = self.wbt.astype(self.stream_dtype)
        # bottleneck weight with 1/S folded in, cached per spatial size
        # (one-time preprocessing, not a per-call wrapper op).
        self._wb_scaled_cache = {}

    def _wb_scaled(self, spatial: int):
        w = self._wb_scaled_cache.get(spatial)
        if w is None:
            w = (self.wb * (1.0 / float(spatial))).astype(self.stream_dtype)
            self._wb_scaled_cache[spatial] = w
        return w

    def forward(self, x_conv_nchw, x_t, training: bool = False):
        """x_conv_nchw: [B, C_conv, H, W] backbone conv features (NCHW)
           x_t:         [B, embed_dim]    backbone transformer token"""
        B, C, H, W = x_conv_nchw.shape
        assert C == self.conv_channels
        S = H * W
        E = self.embed_dim
        ncp = self.nc_pad
        sdt = self.stream_dtype

        # NHWC flatten: [B, S, C] so the last dim (C) is lane-dense.  One
        # upstream XLA transpose, done in the streaming dtype.
        x_conv = jnp.transpose(x_conv_nchw.astype(sdt), (0, 2, 3, 1)).reshape(B, S, C)
        x_t_s = x_t.astype(sdt)
        wb_s = self._wb_scaled(S)

        # --- padding- & generation-aware VMEM budgeting -----------------
        def conv_block_bytes(tb):
            return _padded_block_bytes((tb, S, C), sdt)

        def footprint(tb):
            b = 0
            b += 2 * conv_block_bytes(tb)                               # x_conv (x2 buffers)
            b += 2 * _padded_block_bytes((tb, E), sdt)                  # x_t    (x2 buffers)
            # weights/biases: single-buffered (pl.Buffered(1))
            b += _padded_block_bytes((C, 256), sdt)
            b += _padded_block_bytes((256, ncp), sdt)
            b += _padded_block_bytes((E, 256), sdt)
            b += 2 * _padded_block_bytes((1, 256), jnp.float32)
            b += _padded_block_bytes((1, ncp), jnp.float32)
            # outputs (x2 buffers each)
            b += 2 * 2 * _padded_block_bytes((tb, ncp), jnp.float32)
            if training:
                b += 2 * 2 * _padded_block_bytes((tb, 256), jnp.float32)
            return b

        cap = _tpu_vmem_capacity_bytes()                 # 64 MiB v7x, 128 MiB v5e/v6e
        budget = int(0.55 * cap)                         # leave headroom for scratch
        per_buffer_cap = 12 * 1024 * 1024                # ~8-12 MiB conv block / buffer

        tb = _pick_batch_tile(B, footprint, conv_block_bytes, budget, per_buffer_cap)
        grid = (B // tb,)
        needed = footprint(tb)
        vmem_limit = int(min(cap, max(needed + (8 << 20), 32 << 20)))

        # --- specs -------------------------------------------------------
        const = pl.Buffered(1)   # weights: block index never changes -> single buffer
        in_specs = [
            pl.BlockSpec((tb, S, C), lambda i: (i, 0, 0)),                       # x_conv
            pl.BlockSpec((tb, E), lambda i: (i, 0)),                             # x_t
            pl.BlockSpec((C, 256), lambda i: (0, 0), pipeline_mode=const),       # wb/S
            pl.BlockSpec((1, 256), lambda i: (0, 0), pipeline_mode=const),       # bb
            pl.BlockSpec((256, ncp), lambda i: (0, 0), pipeline_mode=const),     # wc (padded)
            pl.BlockSpec((1, ncp), lambda i: (0, 0), pipeline_mode=const),       # bc (padded)
            pl.BlockSpec((E, 256), lambda i: (0, 0), pipeline_mode=const),       # wbt
            pl.BlockSpec((1, 256), lambda i: (0, 0), pipeline_mode=const),       # bbt
        ]
        out_shapes = [
            jax.ShapeDtypeStruct((B, ncp), jnp.float32),     # conv_cls (padded)
            jax.ShapeDtypeStruct((B, ncp), jnp.float32),     # tran_cls (padded)
        ]
        out_specs = [
            pl.BlockSpec((tb, ncp), lambda i: (i, 0)),
            pl.BlockSpec((tb, ncp), lambda i: (i, 0)),
        ]
        if training:
            out_shapes += [jax.ShapeDtypeStruct((B, 256), jnp.float32),   # x_p
                           jax.ShapeDtypeStruct((B, 256), jnp.float32)]   # x_t embed
            out_specs += [pl.BlockSpec((tb, 256), lambda i: (i, 0)),
                          pl.BlockSpec((tb, 256), lambda i: (i, 0))]

        # --- cost estimate (HBM-dominated) --------------------------------
        def nbytes(a):
            return int(a.size) * a.dtype.itemsize

        flops = (B * S * C                       # pool adds
                 + 2 * B * C * 256               # bottleneck
                 + 2 * B * E * 256               # bottleneck_t
                 + 2 * 2 * B * 256 * ncp)        # cls_head (both branches)
        bytes_accessed = (nbytes(x_conv) + nbytes(x_t_s)
                          + nbytes(wb_s) + nbytes(self.wc_s) + nbytes(self.wbt_s)
                          + nbytes(self.bb) + nbytes(self.bc_pad) + nbytes(self.bbt)
                          + 2 * B * ncp * 4
                          + (2 * B * 256 * 4 if training else 0))

        kernel = _make_classifier_kernel(training)
        outs = pl.pallas_call(
            kernel,
            grid=grid,
            out_shape=tuple(out_shapes),
            in_specs=in_specs,
            out_specs=tuple(out_specs),
            compiler_params=pltpu.CompilerParams(
                dimension_semantics=("parallel",),
                vmem_limit_bytes=vmem_limit),
            cost_estimate=pl.CostEstimate(flops=int(flops), transcendentals=0,
                                          bytes_accessed=int(bytes_accessed)),
        )(x_conv, x_t_s, wb_s, self.bb, self.wc_s, self.bc_pad,
          self.wbt_s, self.bbt)

        conv_cls = outs[0][:, :self.num_classes]
        tran_cls = outs[1][:, :self.num_classes]
        if training:
            return conv_cls, outs[2], tran_cls, outs[3]
        return conv_cls, tran_cls


if __name__ == "__main__":
    key = jax.random.PRNGKey(0)
    k_model, k_bb1, k_bb2, k_x = jax.random.split(key, 4)

    # Small, shape-consistent config.
    batch = 2
    num_classes = 8
    embed_dim = 32
    channel_ratio = 4              # -> conv feature channels = 1024
    conv_channels = int(256 * channel_ratio)
    Hf = Wf = 4                    # backbone spatial output
    img_c, img_h, img_w = 3, 16, 16

    # TODO(synk): the backbone is an externally supplied nn.Module in the
    # reference code; here a deterministic stand-in projection (plain JAX glue)
    # produces (x_conv [B,C,Hf,Wf] NCHW, x_t [B,embed_dim]).
    x = jax.random.normal(k_x, (batch, img_c, img_h, img_w), jnp.float32)
    flat = x.reshape(batch, -1)
    p_conv = 0.02 * jax.random.normal(k_bb1, (flat.shape[1], conv_channels * Hf * Wf), jnp.float32)
    p_tran = 0.02 * jax.random.normal(k_bb2, (flat.shape[1], embed_dim), jnp.float32)
    x_conv = (flat @ p_conv).reshape(batch, conv_channels, Hf, Wf)   # NCHW
    x_t = flat @ p_tran                                              # [B, embed_dim]

    # Plain-JAX f32 reference.
    def reference(m):
        xp_ref = jnp.mean(x_conv, axis=(2, 3)) @ m.wb + m.bb
        conv_cls_ref = xp_ref @ m.wc + m.bc
        xt_ref = x_t @ m.wbt + m.bbt
        tran_cls_ref = xt_ref @ m.wc + m.bc
        return conv_cls_ref, xp_ref, tran_cls_ref, xt_ref

    # ---- f32-streaming instance: tight-tolerance correctness check -------
    model_f32 = ClassifierV1Pallas(k_model, num_classes=num_classes,
                                   embed_dim=embed_dim, channel_ratio=channel_ratio,
                                   stream_dtype=jnp.float32)
    cc_ref, xp_ref, tc_ref, xt_ref = reference(model_f32)

    cc, tc = model_f32.forward(x_conv, x_t, training=False)
    cc_t, xp, tc_t, xt_emb = model_f32.forward(x_conv, x_t, training=True)
    jax.block_until_ready((cc, tc, cc_t, xp, tc_t, xt_emb))
    assert jnp.allclose(cc, cc_ref, atol=1e-4, rtol=1e-4)
    assert jnp.allclose(tc, tc_ref, atol=1e-4, rtol=1e-4)
    assert jnp.allclose(cc_t, cc_ref, atol=1e-4, rtol=1e-4)
    assert jnp.allclose(tc_t, tc_ref, atol=1e-4, rtol=1e-4)
    assert jnp.allclose(xp, xp_ref, atol=1e-4, rtol=1e-4)
    assert jnp.allclose(xt_emb, xt_ref, atol=1e-4, rtol=1e-4)

    # ---- bf16-streaming instance (default, perf config): loose tolerance --
    model_bf16 = ClassifierV1Pallas(k_model, num_classes=num_classes,
                                    embed_dim=embed_dim, channel_ratio=channel_ratio,
                                    stream_dtype=jnp.bfloat16)
    cc_b, tc_b = model_bf16.forward(x_conv, x_t, training=False)
    cc_bt, xp_b, tc_bt, xt_b = model_bf16.forward(x_conv, x_t, training=True)
    jax.block_until_ready((cc_b, tc_b, cc_bt, xp_b, tc_bt, xt_b))
    assert jnp.allclose(cc_b, cc_ref, atol=2e-2, rtol=5e-2)
    assert jnp.allclose(tc_b, tc_ref, atol=2e-2, rtol=5e-2)
    assert jnp.allclose(cc_bt, cc_ref, atol=2e-2, rtol=5e-2)
    assert jnp.allclose(tc_bt, tc_ref, atol=2e-2, rtol=5e-2)
    assert jnp.allclose(xp_b, xp_ref, atol=2e-2, rtol=5e-2)
    assert jnp.allclose(xt_b, xt_ref, atol=2e-2, rtol=5e-2)

    print("KERNEL_OK")
</pallas_src>

<mosaic_0001>
module attributes {stable_mosaic.version = 11 : i64} {
  func.func @kernel(%arg0: i32, %arg1: memref<2x16x1024xf32, #tpu.memory_space<vmem>>, %arg2: memref<2x32xf32, #tpu.memory_space<vmem>>, %arg3: memref<1024x256xf32, #tpu.memory_space<vmem>>, %arg4: memref<1x256xf32, #tpu.memory_space<vmem>>, %arg5: memref<256x128xf32, #tpu.memory_space<vmem>>, %arg6: memref<1x128xf32, #tpu.memory_space<vmem>>, %arg7: memref<32x256xf32, #tpu.memory_space<vmem>>, %arg8: memref<1x256xf32, #tpu.memory_space<vmem>>, %arg9: memref<2x128xf32, #tpu.memory_space<vmem>>, %arg10: memref<2x128xf32, #tpu.memory_space<vmem>>) attributes {dimension_semantics = [#tpu.dimension_semantics<parallel>], iteration_bounds = array<i64: 1>, scalar_prefetch = 0 : i64, scratch_operands = 0 : i64, tpu.core_type = #tpu.core_type<tc>, window_params = [{transform_indices = @transform_0, window_bounds = array<i64: 2, 16, 1024>}, {transform_indices = @transform_1, window_bounds = array<i64: 2, 32>}, {pipeline_mode = #tpu.pipeline_mode<synchronous>, transform_indices = @transform_2, window_bounds = array<i64: 1024, 256>}, {pipeline_mode = #tpu.pipeline_mode<synchronous>, transform_indices = @transform_3, window_bounds = array<i64: 1, 256>}, {pipeline_mode = #tpu.pipeline_mode<synchronous>, transform_indices = @transform_4, window_bounds = array<i64: 256, 128>}, {pipeline_mode = #tpu.pipeline_mode<synchronous>, transform_indices = @transform_5, window_bounds = array<i64: 1, 128>}, {pipeline_mode = #tpu.pipeline_mode<synchronous>, transform_indices = @transform_6, window_bounds = array<i64: 32, 256>}, {pipeline_mode = #tpu.pipeline_mode<synchronous>, transform_indices = @transform_7, window_bounds = array<i64: 1, 256>}, {transform_indices = @transform_8, window_bounds = array<i64: 2, 128>}, {transform_indices = @transform_9, window_bounds = array<i64: 2, 128>}]} {
    %c0 = arith.constant 0 : index
    %c0_0 = arith.constant 0 : index
    %c0_1 = arith.constant 0 : index
    %0 = vector.load %arg1[%c0, %c0_0, %c0_1] : memref<2x16x1024xf32, #tpu.memory_space<vmem>>, vector<2x16x1024xf32>
    %cst = arith.constant dense<0.000000e+00> : vector<2x1024xf32>
    %1 = vector.multi_reduction <add>, %0, %cst [1] : vector<2x16x1024xf32> to vector<2x1024xf32>
    %c0_2 = arith.constant 0 : index
    %c0_3 = arith.constant 0 : index
    %2 = vector.load %arg3[%c0_2, %c0_3] : memref<1024x256xf32, #tpu.memory_space<vmem>>, vector<1024x256xf32>
    %cst_4 = arith.constant dense<0.000000e+00> : vector<2x256xf32>
    %3 = tpu.matmul %1, %2, %cst_4 {dimension_numbers = #tpu.dot_dimension_numbers<[1], [0], [0], [1], [0, 0, 1, 1], [], []>} : vector<2x1024xf32>, vector<1024x256xf32>, vector<2x256xf32> -> vector<2x256xf32>
    %c0_5 = arith.constant 0 : index
    %c0_6 = arith.constant 0 : index
    %4 = vector.load %arg4[%c0_5, %c0_6] : memref<1x256xf32, #tpu.memory_space<vmem>>, vector<1x256xf32>
    %5 = vector.broadcast %4 : vector<1x256xf32> to vector<2x256xf32>
    %6 = arith.addf %3, %5 : vector<2x256xf32>
    %c0_7 = arith.constant 0 : index
    %c0_8 = arith.constant 0 : index
    %7 = vector.load %arg7[%c0_7, %c0_8] : memref<32x256xf32, #tpu.memory_space<vmem>>, vector<32x256xf32>
    %c0_9 = arith.constant 0 : index
    %c0_10 = arith.constant 0 : index
    %8 = vector.load %arg2[%c0_9, %c0_10] : memref<2x32xf32, #tpu.memory_space<vmem>>, vector<2x32xf32>
    %cst_11 = arith.constant dense<0.000000e+00> : vector<2x256xf32>
    %9 = tpu.matmul %8, %7, %cst_11 {dimension_numbers = #tpu.dot_dimension_numbers<[1], [0], [0], [1], [0, 0, 1, 1], [], []>} : vector<2x32xf32>, vector<32x256xf32>, vector<2x256xf32> -> vector<2x256xf32>
    %c0_12 = arith.constant 0 : index
    %c0_13 = arith.constant 0 : index
    %10 = vector.load %arg8[%c0_12, %c0_13] : memref<1x256xf32, #tpu.memory_space<vmem>>, vector<1x256xf32>
    %11 = vector.broadcast %10 : vector<1x256xf32> to vector<2x256xf32>
    %12 = arith.addf %9, %11 : vector<2x256xf32>
    %c0_14 = arith.constant 0 : index
    %c0_15 = arith.constant 0 : index
    %13 = vector.load %arg5[%c0_14, %c0_15] : memref<256x128xf32, #tpu.memory_space<vmem>>, vector<256x128xf32>
    %c0_16 = arith.constant 0 : index
    %c0_17 = arith.constant 0 : index
    %14 = vector.load %arg6[%c0_16, %c0_17] : memref<1x128xf32, #tpu.memory_space<vmem>>, vector<1x128xf32>
    %cst_18 = arith.constant dense<0.000000e+00> : vector<2x128xf32>
    %15 = tpu.matmul %6, %13, %cst_18 {dimension_numbers = #tpu.dot_dimension_numbers<[1], [0], [0], [1], [0, 0, 1, 1], [], []>} : vector<2x256xf32>, vector<256x128xf32>, vector<2x128xf32> -> vector<2x128xf32>
    %16 = vector.broadcast %14 : vector<1x128xf32> to vector<2x128xf32>
    %17 = arith.addf %15, %16 : vector<2x128xf32>
    %c0_19 = arith.constant 0 : index
    %c0_20 = arith.constant 0 : index
    %18 = vector.load %arg9[%c0_19, %c0_20] : memref<2x128xf32, #tpu.memory_space<vmem>>, vector<2x128xf32>
    tpu.vector_store %arg9[%c0_19, %c0_20], %17 {strides = array<i32>} : memref<2x128xf32, #tpu.memory_space<vmem>>, vector<2x128xf32>,
    %cst_21 = arith.constant dense<0.000000e+00> : vector<2x128xf32>
    %19 = tpu.matmul %12, %13, %cst_21 {dimension_numbers = #tpu.dot_dimension_numbers<[1], [0], [0], [1], [0, 0, 1, 1], [], []>} : vector<2x256xf32>, vector<256x128xf32>, vector<2x128xf32> -> vector<2x128xf32>
    %20 = vector.broadcast %14 : vector<1x128xf32> to vector<2x128xf32>
    %21 = arith.addf %19, %20 : vector<2x128xf32>
    %c0_22 = arith.constant 0 : index
    %c0_23 = arith.constant 0 : index
    %22 = vector.load %arg10[%c0_22, %c0_23] : memref<2x128xf32, #tpu.memory_space<vmem>>, vector<2x128xf32>
    tpu.vector_store %arg10[%c0_22, %c0_23], %21 {strides = array<i32>} : memref<2x128xf32, #tpu.memory_space<vmem>>, vector<2x128xf32>,
    return
  }
  func.func @transform_0(%arg0: i32) -> (i32, i32, i32) {
    %c0_i32 = arith.constant 0 : i32
    %c0_i32_0 = arith.constant 0 : i32
    %c0_i32_1 = arith.constant 0 : i32
    return %arg0, %c0_i32, %c0_i32_0 : i32, i32, i32
  }
  func.func @transform_1(%arg0: i32) -> (i32, i32) {
    %c0_i32 = arith.constant 0 : i32
    %c0_i32_0 = arith.constant 0 : i32
    return %arg0, %c0_i32 : i32, i32
  }
  func.func @transform_2(%arg0: i32) -> (i32, i32) {
    %c0_i32 = arith.constant 0 : i32
    %c0_i32_0 = arith.constant 0 : i32
    %c0_i32_1 = arith.constant 0 : i32
    return %c0_i32, %c0_i32_0 : i32, i32
  }
  func.func @transform_3(%arg0: i32) -> (i32, i32) {
    %c0_i32 = arith.constant 0 : i32
    %c0_i32_0 = arith.constant 0 : i32
    %c0_i32_1 = arith.constant 0 : i32
    return %c0_i32, %c0_i32_0 : i32, i32
  }
  func.func @transform_4(%arg0: i32) -> (i32, i32) {
    %c0_i32 = arith.constant 0 : i32
    %c0_i32_0 = arith.constant 0 : i32
    %c0_i32_1 = arith.constant 0 : i32
    return %c0_i32, %c0_i32_0 : i32, i32
  }
  func.func @transform_5(%arg0: i32) -> (i32, i32) {
    %c0_i32 = arith.constant 0 : i32
    %c0_i32_0 = arith.constant 0 : i32
    %c0_i32_1 = arith.constant 0 : i32
    return %c0_i32, %c0_i32_0 : i32, i32
  }
  func.func @transform_6(%arg0: i32) -> (i32, i32) {
    %c0_i32 = arith.constant 0 : i32
    %c0_i32_0 = arith.constant 0 : i32
    %c0_i32_1 = arith.constant 0 : i32
    return %c0_i32, %c0_i32_0 : i32, i32
  }
  func.func @transform_7(%arg0: i32) -> (i32, i32) {
    %c0_i32 = arith.constant 0 : i32
    %c0_i32_0 = arith.constant 0 : i32
    %c0_i32_1 = arith.constant 0 : i32
    return %c0_i32, %c0_i32_0 : i32, i32
  }
  func.func @transform_8(%arg0: i32) -> (i32, i32) {
    %c0_i32 = arith.constant 0 : i32
    %c0_i32_0 = arith.constant 0 : i32
    return %arg0, %c0_i32 : i32, i32
  }
  func.func @transform_9(%arg0: i32) -> (i32, i32) {
    %c0_i32 = arith.constant 0 : i32
    %c0_i32_0 = arith.constant 0 : i32
    return %arg0, %c0_i32 : i32, i32
  }
}

</mosaic_0001>

<bundles_post_ra>
// kernel: tpu_custom_call.1
= control target key start
LH: loop header
LB: loop body
LE: loop exit
PB: predicated region body
PF: predicated region fallthrough
CT: control target
= control target key end

     0   :  { %15 = vsyncpa [#allocation3], 0  ;;  %s1454_s0 = inlined_call_operand.hbm [shape: f32[2,16,1024], index: 0, kind: input, shape index: {}]   ;;  %s1455_s1 = inlined_call_operand.hbm [shape: f32[2,32], index: 1, kind: input, shape index: {}]   ;;  %s1456_s2 = inlined_call_operand.hbm [shape: f32[1024,256], index: 2, kind: input, shape index: {}]   ;;  %s1457_s3 = inlined_call_operand.vmem [shape: f32[1,256], index: 3, kind: input, shape index: {}]   ;;  %s1458_s4 = inlined_call_operand.hbm [shape: f32[256,128], index: 4, kind: input, shape index: {}]   ;;  %s1459_s5 = inlined_call_operand.hbm [shape: f32[1,128], index: 5, kind: input, shape index: {}]   ;;  %s1460_s6 = inlined_call_operand.hbm [shape: f32[32,256], index: 6, kind: input, shape index: {}]   ;;  %s1461_s7 = inlined_call_operand.vmem [shape: f32[1,256], index: 7, kind: input, shape index: {}]   ;;  %s1462_s8 = inlined_call_operand.hbm [shape: f32[2,128], index: 8, kind: output, shape index: {0}]   ;;  %s1463_s9 = inlined_call_operand.hbm [shape: f32[2,128], index: 9, kind: output, shape index: {1}]  }
   0x1   :  { %16 = vsyncpa [#allocation6], 0 }
   0x2   :  { %17 = vsyncpa [#allocation9], 0 }
   0x3   :  { %18 = vsyncpa [#allocation12], 0 }
   0x4   :  { %19 = vsyncpa [#allocation4], 0  ;;  %s39_s11 = sshll.u32 %s1455_s1, 4  ;;  %s40_s11 = int_to_ptr.hbm [resolvable:$true] %s39_s11 }
   0x5   :  { %20 = vsyncpa [#allocation15], 0  ;;  %s1316_s12 = smov [#allocation5]   ;;  %s64_s16 = sshll.u32 %s1458_s4, 4  ;;  %s65_s16 = int_to_ptr.hbm [resolvable:$true] %s64_s16 }
   0x6   :  { %s41_s13 = sshll.u32 %s1316_s12, 4  ;;  %s1317_s17 = smov [#allocation8]   ;;  %s42_s13 = int_to_ptr.vmem [resolvable:$true] %s41_s13 }
   0x7   :  { %44 = dma.hbm_to_vmem [thread:$0]  %s40_s11, 32, %s42_s13, [#allocation6]  }
   0x8   :  { %s66_s18 = sshll.u32 %s1317_s17, 4  ;;  %s1318_s19 = smov 128   ;;  %s67_s18 = int_to_ptr.vmem [resolvable:$true] %s66_s18 }
   0x9   :  { %s1319_s20 = smov 8   ;;  %s25_s1 = sshll.u32 %s1454_s0, 4  ;;  %s26_s1 = int_to_ptr.hbm [resolvable:$true] %s25_s1 }
   0xa   :  { %72 = dma.hbm_to_vmem [thread:$0]  %s65_s16, 4096, %s67_s18, [#allocation9], %s1318_s19, %s1318_s19, %s1319_s20  }
   0xb   :  { %s1320_s23 = smov [#allocation2]   ;;  %s49_s4 = sshll.u32 %s1456_s2, 4  ;;  %s50_s4 = int_to_ptr.hbm [resolvable:$true] %s49_s4 }
   0xc   :  { %s27_s24 = sshll.u32 %s1320_s23, 4  ;;  %s1321_s27 = smov 1024   ;;  %s28_s24 = int_to_ptr.vmem [resolvable:$true] %s27_s24 }
   0xd   :  { %s1322_s28 = smov 64   ;;  %s1323_s29 = smov [#allocation7]  }
   0xe   :  { %33 = dma.hbm_to_vmem [thread:$0]  %s26_s1, 4096, %s28_s24, [#allocation3], %s1321_s27, %s1321_s27, %s1322_s28  }
   0xf   :  { %s51_s30 = sshll.u32 %s1323_s29, 4  ;;  %s1324_s10 = smov 256   ;;  %s52_s30 = int_to_ptr.vmem [resolvable:$true] %s51_s30 }
  0x10   :  { %s1325_s11 = smov 16   ;;  %s78_s13 = sshll.u32 %s1459_s5, 4  ;;  %s79_s13 = int_to_ptr.hbm [resolvable:$true] %s78_s13 }
  0x11   :  { %57 = dma.hbm_to_vmem [thread:$0]  %s50_s4, 32768, %s52_s30, [#allocation6], %s1324_s10, %s1324_s10, %s1325_s11  }
  0x12   :  { %s1326_s14 = smov [#allocation10]   ;;  %s88_s17 = sshll.u32 %s1460_s6, 4  ;;  %s89_s17 = int_to_ptr.hbm [resolvable:$true] %s88_s17 }
  0x13   :  { %s80_s15 = sshll.u32 %s1326_s14, 4  ;;  %s1327_s18 = smov [#allocation11]   ;;  %s81_s15 = int_to_ptr.vmem [resolvable:$true] %s80_s15 }
  0x14   :  { %83 = dma.hbm_to_vmem [thread:$0]  %s79_s13, 16, %s81_s15, [#allocation9]  }
  0x15   :  { %s90_s19 = sshll.u32 %s1327_s18, 4  ;;  %s91_s19 = int_to_ptr.vmem [resolvable:$true] %s90_s19 }
  0x16   :  { %96 = dma.hbm_to_vmem [thread:$0]  %s89_s17, 1024, %s91_s19, [#allocation12], %s1324_s10, %s1324_s10, %s1325_s11  }
  0x17   :  { %1304 = dma.done.wait [#allocation3], 4096  }
  0x18   :  { %1305 = vsyncadd [#allocation3], 4294963200 }
  0x19   :  { %1306 = dma.done.wait [#allocation6], 32800  }
  0x1a   :  { %1307 = vsyncadd [#allocation6], 4294934496 }
  0x1b   :  { %1308 = dma.done.wait [#allocation9], 4112  }
  0x1c   :  { %1309 = vsyncadd [#allocation9], 4294963184 }
  0x1d   :  { %1310 = dma.done.wait [#allocation12], 1024  }
  0x1e   :  { %1311 = vsyncadd [#allocation12], 4294966272  ;;  %v361_v0 = vld [vmem:[#allocation7 + $0x2f0] sm:$0xff]  ;;  %v359_v2 = vld [vmem:[#allocation7 + $0x2e0] sm:$0xff]  ;;  %vm545_vm0 = vcmask 1041409   ;;  %vm897_vm1 = vcmask 261120  }
  0x1f   :  { %v297_v1 = vld [vmem:[#allocation7 + $0xf0] sm:$0xff]  ;;  %602 = vmatpush.msra.mxu2 %v361_v0  ;;  %v295_v4 = vld [vmem:[#allocation7 + $0xe0] sm:$0xff]  ;;  %s1328_s21 = smov [#allocation14]   ;;  %s1077_s23 = sshll.u32 %s1463_s9, 4  ;;  %s1078_s23 = int_to_ptr.hbm [resolvable:$true] %s1077_s23 }
  0x20   :  { %562 = vmatpush.msra.mxu0 %v297_v1  ;;  %v393_v3 = vld [vmem:[#allocation7 + $0x3f0] sm:$0xff]  ;;  %v391_v7 = vld [vmem:[#allocation7 + $0x3e0] sm:$0xff]  ;;  %s1075_s22 = sshll.u32 %s1328_s21, 4  ;;  %s1329_s24 = smov [#allocation13]   ;;  %s1076_s22 = int_to_ptr.vmem [resolvable:$true] %s1075_s22 }
  0x21   :  { %v329_v5 = vld [vmem:[#allocation7 + $0x1f0] sm:$0xff]  ;;  %622 = vmatpush.msra.mxu3 %v393_v3  ;;  %603 = vmatpush.msra.mxu2 %v359_v2  ;;  %v327_v9 = vld [vmem:[#allocation7 + $0x1e0] sm:$0xff]  ;;  %s1064_s25 = sshll.u32 %s1329_s24, 4  ;;  %s1066_s27 = sshll.u32 %s1462_s8, 4  ;;  %s1065_s25 = int_to_ptr.vmem [resolvable:$true] %s1064_s25  ;;  %s1067_s27 = int_to_ptr.hbm [resolvable:$true] %s1066_s27 }
  0x22   :  { %582 = vmatpush.msra.mxu1 %v329_v5  ;;  %v357_v6 = vld [vmem:[#allocation7 + $0x2d0] sm:$0xff]  ;;  %563 = vmatpush.msra.mxu0 %v295_v4  ;;  %v355_v11 = vld [vmem:[#allocation7 + $0x2c0] sm:$0xff] }
  0x23   :  { %v293_v8 = vld [vmem:[#allocation7 + $0xd0] sm:$0xff]  ;;  %623 = vmatpush.msra.mxu3 %v391_v7  ;;  %v291_v12 = vld [vmem:[#allocation7 + $0xc0] sm:$0xff]  ;;  %604 = vmatpush.msra.mxu2 %v357_v6 }
  0x24   :  { %v389_v10 = vld [vmem:[#allocation7 + $0x3d0] sm:$0xff]  ;;  %583 = vmatpush.msra.mxu1 %v327_v9  ;;  %564 = vmatpush.msra.mxu0 %v293_v8  ;;  %v387_v14 = vld [vmem:[#allocation7 + $0x3c0] sm:$0xff] }
  0x25   :  { %v325_v13 = vld [vmem:[#allocation7 + $0x1d0] sm:$0xff]  ;;  %v323_v15 = vld [vmem:[#allocation7 + $0x1c0] sm:$0xff]  ;;  %624 = vmatpush.msra.mxu3 %v389_v10  ;;  %605 = vmatpush.msra.mxu2 %v355_v11 }
  0x26   :  { %584 = vmatpush.msra.mxu1 %v325_v13  ;;  %v353_v16 = vld [vmem:[#allocation7 + $0x2b0] sm:$0xff]  ;;  %565 = vmatpush.msra.mxu0 %v291_v12  ;;  %v351_v20 = vld [vmem:[#allocation7 + $0x2a0] sm:$0xff] }
  0x27   :  { %v289_v17 = vld [vmem:[#allocation7 + $0xb0] sm:$0xff]  ;;  %625 = vmatpush.msra.mxu3 %v387_v14  ;;  %v287_v21 = vld [vmem:[#allocation7 + $0xa0] sm:$0xff]  ;;  %606 = vmatpush.msra.mxu2 %v353_v16 }
  0x28   :  { %v385_v18 = vld [vmem:[#allocation7 + $0x3b0] sm:$0xff]  ;;  %585 = vmatpush.msra.mxu1 %v323_v15  ;;  %566 = vmatpush.msra.mxu0 %v289_v17  ;;  %v383_v22 = vld [vmem:[#allocation7 + $0x3a0] sm:$0xff] }
  0x29   :  { %v321_v19 = vld [vmem:[#allocation7 + $0x1b0] sm:$0xff]  ;;  %v319_v23 = vld [vmem:[#allocation7 + $0x1a0] sm:$0xff]  ;;  %626 = vmatpush.msra.mxu3 %v385_v18  ;;  %607 = vmatpush.msra.mxu2 %v351_v20 }
  0x2a   :  { %586 = vmatpush.msra.mxu1 %v321_v19  ;;  %v349_v24 = vld [vmem:[#allocation7 + $0x290] sm:$0xff]  ;;  %567 = vmatpush.msra.mxu0 %v287_v21  ;;  %v347_v28 = vld [vmem:[#allocation7 + $0x280] sm:$0xff] }
  0x2b   :  { %v285_v25 = vld [vmem:[#allocation7 + $0x90] sm:$0xff]  ;;  %627 = vmatpush.msra.mxu3 %v383_v22  ;;  %v283_v29 = vld [vmem:[#allocation7 + $0x80] sm:$0xff]  ;;  %608 = vmatpush.msra.mxu2 %v349_v24 }
  0x2c   :  { %v381_v26 = vld [vmem:[#allocation7 + $0x390] sm:$0xff]  ;;  %587 = vmatpush.msra.mxu1 %v319_v23  ;;  %568 = vmatpush.msra.mxu0 %v285_v25  ;;  %v379_v30 = vld [vmem:[#allocation7 + $0x380] sm:$0xff] }
  0x2d   :  { %v317_v27 = vld [vmem:[#allocation7 + $0x190] sm:$0xff]  ;;  %v315_v31 = vld [vmem:[#allocation7 + $0x180] sm:$0xff]  ;;  %628 = vmatpush.msra.mxu3 %v381_v26  ;;  %609 = vmatpush.msra.mxu2 %v347_v28 }
  0x2e   :  { %588 = vmatpush.msra.mxu1 %v317_v27  ;;  %v345_v32 = vld [vmem:[#allocation7 + $0x270] sm:$0xff]  ;;  %569 = vmatpush.msra.mxu0 %v283_v29  ;;  %v343_v36 = vld [vmem:[#allocation7 + $0x260] sm:$0xff] }
  0x2f   :  { %v281_v33 = vld [vmem:[#allocation7 + $0x70] sm:$0xff]  ;;  %629 = vmatpush.msra.mxu3 %v379_v30  ;;  %v279_v37 = vld [vmem:[#allocation7 + $0x60] sm:$0xff]  ;;  %610 = vmatpush.msra.mxu2 %v345_v32 }
  0x30   :  { %v377_v34 = vld [vmem:[#allocation7 + $0x370] sm:$0xff]  ;;  %589 = vmatpush.msra.mxu1 %v315_v31  ;;  %570 = vmatpush.msra.mxu0 %v281_v33  ;;  %v375_v38 = vld [vmem:[#allocation7 + $0x360] sm:$0xff] }
  0x31   :  { %v313_v35 = vld [vmem:[#allocation7 + $0x170] sm:$0xff]  ;;  %v311_v39 = vld [vmem:[#allocation7 + $0x160] sm:$0xff]  ;;  %630 = vmatpush.msra.mxu3 %v377_v34  ;;  %611 = vmatpush.msra.mxu2 %v343_v36 }
  0x32   :  { %590 = vmatpush.msra.mxu1 %v313_v35  ;;  %v341_v40 = vld [vmem:[#allocation7 + $0x250] sm:$0xff]  ;;  %571 = vmatpush.msra.mxu0 %v279_v37  ;;  %v339_v44 = vld [vmem:[#allocation7 + $0x240] sm:$0xff] }
  0x33   :  { %v277_v41 = vld [vmem:[#allocation7 + $0x50] sm:$0xff]  ;;  %631 = vmatpush.msra.mxu3 %v375_v38  ;;  %v275_v45 = vld [vmem:[#allocation7 + $0x40] sm:$0xff]  ;;  %612 = vmatpush.msra.mxu2 %v341_v40 }
  0x34   :  { %v373_v42 = vld [vmem:[#allocation7 + $0x350] sm:$0xff]  ;;  %591 = vmatpush.msra.mxu1 %v311_v39  ;;  %572 = vmatpush.msra.mxu0 %v277_v41  ;;  %v371_v46 = vld [vmem:[#allocation7 + $0x340] sm:$0xff] }
  0x35   :  { %v309_v43 = vld [vmem:[#allocation7 + $0x150] sm:$0xff]  ;;  %v307_v47 = vld [vmem:[#allocation7 + $0x140] sm:$0xff]  ;;  %632 = vmatpush.msra.mxu3 %v373_v42  ;;  %613 = vmatpush.msra.mxu2 %v339_v44 }
  0x36   :  { %592 = vmatpush.msra.mxu1 %v309_v43  ;;  %v337_v48 = vld [vmem:[#allocation7 + $0x230] sm:$0xff]  ;;  %573 = vmatpush.msra.mxu0 %v275_v45  ;;  %v335_v52 = vld [vmem:[#allocation7 + $0x220] sm:$0xff] }
  0x37   :  { %v273_v49 = vld [vmem:[#allocation7 + $0x30] sm:$0xff]  ;;  %633 = vmatpush.msra.mxu3 %v371_v46  ;;  %v271_v53 = vld [vmem:[#allocation7 + $0x20] sm:$0xff]  ;;  %614 = vmatpush.msra.mxu2 %v337_v48 }
  0x38   :  { %v369_v50 = vld [vmem:[#allocation7 + $0x330] sm:$0xff]  ;;  %593 = vmatpush.msra.mxu1 %v307_v47  ;;  %574 = vmatpush.msra.mxu0 %v273_v49  ;;  %v367_v54 = vld [vmem:[#allocation7 + $0x320] sm:$0xff] }
  0x39   :  { %v305_v51 = vld [vmem:[#allocation7 + $0x130] sm:$0xff]  ;;  %v303_v55 = vld [vmem:[#allocation7 + $0x120] sm:$0xff]  ;;  %634 = vmatpush.msra.mxu3 %v369_v50  ;;  %615 = vmatpush.msra.mxu2 %v335_v52 }
  0x3a   :  { %594 = vmatpush.msra.mxu1 %v305_v51  ;;  %v333_v56 = vld [vmem:[#allocation7 + $0x210] sm:$0xff]  ;;  %575 = vmatpush.msra.mxu0 %v271_v53  ;;  %v331_v60 = vld [vmem:[#allocation7 + $0x200] sm:$0xff] }
  0x3b   :  { %v269_v57 = vld [vmem:[#allocation7 + $0x10] sm:$0xff]  ;;  %635 = vmatpush.msra.mxu3 %v367_v54  ;;  %v267_v61 = vld [vmem:[#allocation7] sm:$0xff]  ;;  %616 = vmatpush.msra.mxu2 %v333_v56 }
  0x3c   :  { %v365_v58 = vld [vmem:[#allocation7 + $0x310] sm:$0xff]  ;;  %595 = vmatpush.msra.mxu1 %v303_v55  ;;  %576 = vmatpush.msra.mxu0 %v269_v57  ;;  %v363_v63 = vld [vmem:[#allocation7 + $0x300] sm:$0xff] }
  0x3d   :  { %v301_v59 = vld [vmem:[#allocation7 + $0x110] sm:$0xff]  ;;  %636 = vmatpush.msra.mxu3 %v365_v58  ;;  %617 = vmatpush.msra.mxu2 %v331_v60  ;;  %v487_v2 = vld [vmem:[#allocation7 + $0x6e0] sm:$0xff] }
  0x3e   :  { %v489_v62 = vld [vmem:[#allocation7 + $0x6f0] sm:$0xff]  ;;  %596 = vmatpush.msra.mxu1 %v301_v59  ;;  %577 = vmatpush.msra.mxu0 %v267_v61  ;;  %v299_v3 = vld [vmem:[#allocation7 + $0x100] sm:$0xff] }
  0x3f   :  { %v425_v0 = vld [vmem:[#allocation7 + $0x4f0] sm:$0xff]  ;;  %682 = vmatpush.msrb.mxu2 %v489_v62  ;;  %637 = vmatpush.msra.mxu3 %v363_v63  ;;  %v423_v4 = vld [vmem:[#allocation7 + $0x4e0] sm:$0xff] }
  0x40   :  { %v521_v1 = vld [vmem:[#allocation7 + $0x7f0] sm:$0xff]  ;;  %642 = vmatpush.msrb.mxu0 %v425_v0  ;;  %v519_v7 = vld [vmem:[#allocation7 + $0x7e0] sm:$0xff]  ;;  %597 = vmatpush.msra.mxu1 %v299_v3 }
  0x41   :  { %v457_v5 = vld [vmem:[#allocation7 + $0x5f0] sm:$0xff]  ;;  %702 = vmatpush.msrb.mxu3 %v521_v1  ;;  %683 = vmatpush.msrb.mxu2 %v487_v2  ;;  %v455_v9 = vld [vmem:[#allocation7 + $0x5e0] sm:$0xff] }
  0x42   :  { %v485_v6 = vld [vmem:[#allocation7 + $0x6d0] sm:$0xff]  ;;  %643 = vmatpush.msrb.mxu0 %v423_v4  ;;  %662 = vmatpush.msrb.mxu1 %v457_v5  ;;  %v483_v10 = vld [vmem:[#allocation7 + $0x6c0] sm:$0xff] }
  0x43   :  { %v421_v8 = vld [vmem:[#allocation7 + $0x4d0] sm:$0xff]  ;;  %684 = vmatpush.msrb.mxu2 %v485_v6  ;;  %703 = vmatpush.msrb.mxu3 %v519_v7  ;;  %v419_v12 = vld [vmem:[#allocation7 + $0x4c0] sm:$0xff] }
  0x44   :  { %v517_v11 = vld [vmem:[#allocation7 + $0x7d0] sm:$0xff]  ;;  %644 = vmatpush.msrb.mxu0 %v421_v8  ;;  %663 = vmatpush.msrb.mxu1 %v455_v9  ;;  %v515_v15 = vld [vmem:[#allocation7 + $0x7c0] sm:$0xff] }
  0x45   :  { %v453_v13 = vld [vmem:[#allocation7 + $0x5d0] sm:$0xff]  ;;  %685 = vmatpush.msrb.mxu2 %v483_v10  ;;  %704 = vmatpush.msrb.mxu3 %v517_v11  ;;  %v451_v17 = vld [vmem:[#allocation7 + $0x5c0] sm:$0xff] }
  0x46   :  { %v481_v14 = vld [vmem:[#allocation7 + $0x6b0] sm:$0xff]  ;;  %v479_v18 = vld [vmem:[#allocation7 + $0x6a0] sm:$0xff]  ;;  %645 = vmatpush.msrb.mxu0 %v419_v12  ;;  %664 = vmatpush.msrb.mxu1 %v453_v13 }
  0x47   :  { %v417_v16 = vld [vmem:[#allocation7 + $0x4b0] sm:$0xff]  ;;  %v415_v20 = vld [vmem:[#allocation7 + $0x4a0] sm:$0xff]  ;;  %686 = vmatpush.msrb.mxu2 %v481_v14  ;;  %705 = vmatpush.msrb.mxu3 %v515_v15 }
  0x48   :  { %v513_v19 = vld [vmem:[#allocation7 + $0x7b0] sm:$0xff]  ;;  %v511_v23 = vld [vmem:[#allocation7 + $0x7a0] sm:$0xff]  ;;  %646 = vmatpush.msrb.mxu0 %v417_v16  ;;  %665 = vmatpush.msrb.mxu1 %v451_v17 }
  0x49   :  { %v449_v21 = vld [vmem:[#allocation7 + $0x5b0] sm:$0xff]  ;;  %v447_v25 = vld [vmem:[#allocation7 + $0x5a0] sm:$0xff]  ;;  %687 = vmatpush.msrb.mxu2 %v479_v18  ;;  %706 = vmatpush.msrb.mxu3 %v513_v19 }
  0x4a   :  { %v477_v22 = vld [vmem:[#allocation7 + $0x690] sm:$0xff]  ;;  %v475_v26 = vld [vmem:[#allocation7 + $0x680] sm:$0xff]  ;;  %647 = vmatpush.msrb.mxu0 %v415_v20  ;;  %666 = vmatpush.msrb.mxu1 %v449_v21 }
  0x4b   :  { %v413_v24 = vld [vmem:[#allocation7 + $0x490] sm:$0xff]  ;;  %v411_v30 = vld [vmem:[#allocation7 + $0x480] sm:$0xff]  ;;  %688 = vmatpush.msrb.mxu2 %v477_v22  ;;  %707 = vmatpush.msrb.mxu3 %v511_v23 }
  0x4c   :  { %v509_v27 = vld [vmem:[#allocation7 + $0x790] sm:$0xff]  ;;  %v507_v36 = vld [vmem:[#allocation7 + $0x780] sm:$0xff]  ;;  %648 = vmatpush.msrb.mxu0 %v413_v24  ;;  %667 = vmatpush.msrb.mxu1 %v447_v25 }
  0x4d   :  { %v125_v28 = vld [vmem:[#allocation2 + $0x10] sm:$0xff]  ;;  %v443_v39 = vld [vmem:[#allocation7 + $0x580] sm:$0xff]  ;;  %v126_v47 = vld [vmem:[#allocation2 + $0x18] sm:$0xff]  ;;  %689 = vmatpush.msrb.mxu2 %v475_v26  ;;  %708 = vmatpush.msrb.mxu3 %v509_v27 }
  0x4e   :  { %v133_v29 = vld [vmem:[#allocation2 + $0x50] sm:$0xff]  ;;  %v123_v41 = vld [vmem:[#allocation2] sm:$0xff]  ;;  %v134_v48 = vld [vmem:[#allocation2 + $0x58] sm:$0xff]  ;;  %649 = vmatpush.msrb.mxu0 %v411_v30 }
  0x4f   :  { %v141_v31 = vld [vmem:[#allocation2 + $0x90] sm:$0xff]  ;;  %v169_v33 = vadd.f32 %v133_v29, %v125_v28  ;;  %v131_v42 = vld [vmem:[#allocation2 + $0x40] sm:$0xff]  ;;  %v142_v52 = vld [vmem:[#allocation2 + $0x98] sm:$0xff]  ;;  %v176_v54 = vadd.f32 %v134_v48, %v126_v47  ;;  %709 = vmatpush.msrb.mxu3 %v507_v36 }
  0x50   :  { %v149_v32 = vld [vmem:[#allocation2 + $0xd0] sm:$0xff]  ;;  %v139_v43 = vld [vmem:[#allocation2 + $0x80] sm:$0xff]  ;;  %v155_v46 = vadd.f32 %v131_v42, %v123_v41  ;;  %v150_v53 = vld [vmem:[#allocation2 + $0xd8] sm:$0xff] }
  0x51   :  { %v445_v34 = vld [vmem:[#allocation7 + $0x590] sm:$0xff]  ;;  %v225_v37 = vadd.f32 %v149_v32, %v141_v31  ;;  %v170_v40 = vrot.slane %v169_v33, 4  ;;  %v147_v45 = vld [vmem:[#allocation2 + $0xc0] sm:$0xff]  ;;  %v232_v60 = vadd.f32 %v150_v53, %v142_v52  ;;  %v177_v0 = vrot.slane %v176_v54, 4  ;;  %v124_v1 = vld [vmem:[#allocation2 + $0x8] sm:$0xff] }
  0x52   :  { %v473_v35 = vld [vmem:[#allocation7 + $0x670] sm:$0xff]  ;;  %v471_v49 = vld [vmem:[#allocation7 + $0x660] sm:$0xff]  ;;  %v211_v51 = vadd.f32 %v147_v45, %v139_v43  ;;  %668 = vmatpush.msrb.mxu1 %v445_v34  ;;  %v156_v59 = vrot.slane %v155_v46, 4 }
  0x53   :  { %v409_v38 = vld [vmem:[#allocation7 + $0x470] sm:$0xff]  ;;  %v226_v44 = vrot.slane %v225_v37, 4  ;;  %v171_v50 = vadd.f32 %v170_v40, %v169_v33  ;;  %v407_v56 = vld [vmem:[#allocation7 + $0x460] sm:$0xff]  ;;  %690 = vmatpush.msrb.mxu2 %v473_v35  ;;  %v233_v6 = vrot.slane %v232_v60, 4  ;;  %v178_v15 = vadd.f32 %v177_v0, %v176_v54 }
  0x54   :  { %v505_v55 = vld [vmem:[#allocation7 + $0x770] sm:$0xff]  ;;  %v212_v63 = vrot.slane %v211_v51, 4  ;;  %v132_v2 = vld [vmem:[#allocation2 + $0x48] sm:$0xff]  ;;  %650 = vmatpush.msrb.mxu0 %v409_v38  ;;  %669 = vmatpush.msrb.mxu1 %v443_v39  ;;  %v157_v5 = vadd.f32 %v156_v59, %v155_v46 }
  0x55   :  { %v441_v57 = vld [vmem:[#allocation7 + $0x570] sm:$0xff]  ;;  %v227_v58 = vadd.f32 %v226_v44, %v225_v37  ;;  %v172_v62 = vrot.slane %v171_v50, 2  ;;  %v503_v3 = vld [vmem:[#allocation7 + $0x760] sm:$0xff]  ;;  %v162_v9 = vadd.f32 %v132_v2, %v124_v1  ;;  %691 = vmatpush.msrb.mxu2 %v471_v49  ;;  %710 = vmatpush.msrb.mxu3 %v505_v55  ;;  %v234_v21 = vadd.f32 %v233_v6, %v232_v60 }
  0x56   :  { %v469_v61 = vld [vmem:[#allocation7 + $0x650] sm:$0xff]  ;;  %v140_v7 = vld [vmem:[#allocation2 + $0x88] sm:$0xff]  ;;  %v213_v14 = vadd.f32 %v212_v63, %v211_v51  ;;  %651 = vmatpush.msrb.mxu0 %v407_v56  ;;  %670 = vmatpush.msrb.mxu1 %v441_v57  ;;  %v158_v20 = vrot.slane %v157_v5, 2  ;;  %v179_v28 = vrot.slane %v178_v15, 2  ;;  %v127_v56 = vld [vmem:[#allocation2 + $0x20] sm:$0xff] }
  0x57   :  { %v228_v4 = vrot.slane %v227_v58, 2  ;;  %v148_v8 = vld [vmem:[#allocation2 + $0xc8] sm:$0xff]  ;;  %v405_v10 = vld [vmem:[#allocation7 + $0x450] sm:$0xff]  ;;  %v173_v13 = vadd.f32 %v172_v62, %v171_v50  ;;  %v163_v22 = vrot.slane %v162_v9, 4  ;;  %692 = vmatpush.msrb.mxu2 %v469_v61  ;;  %711 = vmatpush.msrb.mxu3 %v503_v3  ;;  %v235_v33 = vrot.slane %v234_v21, 2  ;;  %v135_v57 = vld [vmem:[#allocation2 + $0x60] sm:$0xff] }
  0x58   :  { %v439_v11 = vld [vmem:[#allocation7 + $0x560] sm:$0xff]  ;;  %v501_v16 = vld [vmem:[#allocation7 + $0x750] sm:$0xff]  ;;  %v214_v27 = vrot.slane %v213_v14, 2  ;;  %v218_v29 = vadd.f32 %v148_v8, %v140_v7  ;;  %652 = vmatpush.msrb.mxu0 %v405_v10  ;;  %v159_v32 = vadd.f32 %v158_v20, %v157_v5  ;;  %v180_v42 = vadd.f32 %v179_v28, %v178_v15 }
  0x59   :  { %v467_v12 = vld [vmem:[#allocation7 + $0x640] sm:$0xff]  ;;  %v437_v18 = vld [vmem:[#allocation7 + $0x550] sm:$0xff]  ;;  %v229_v19 = vadd.f32 %v228_v4, %v227_v58  ;;  %v174_v26 = vrot.slane %v173_v13, 1  ;;  %671 = vmatpush.msrb.mxu1 %v439_v11  ;;  %v164_v34 = vadd.f32 %v163_v22, %v162_v9  ;;  %712 = vmatpush.msrb.mxu3 %v501_v16  ;;  %v236_v48 = vadd.f32 %v235_v33, %v234_v21  ;;  %v362_v21 = vld [vmem:[#allocation7 + $0x2f8] sm:$0xff] }
  0x5a   :  { %v403_v17 = vld [vmem:[#allocation7 + $0x440] sm:$0xff]  ;;  %v465_v23 = vld [vmem:[#allocation7 + $0x630] sm:$0xff]  ;;  %693 = vmatpush.msrb.mxu2 %v467_v12  ;;  %v215_v41 = vadd.f32 %v214_v27, %v213_v14  ;;  %v219_v43 = vrot.slane %v218_v29, 4  ;;  %v160_v47 = vrot.slane %v159_v32, 1  ;;  %v181_v52 = vrot.slane %v180_v42, 1 }
  0x5b   :  { %v499_v24 = vld [vmem:[#allocation7 + $0x740] sm:$0xff]  ;;  %v401_v25 = vld [vmem:[#allocation7 + $0x430] sm:$0xff]  ;;  %v230_v31 = vrot.slane %v229_v19, 1  ;;  %v175_v40 = vadd.f32 %v174_v26, %v173_v13  ;;  %653 = vmatpush.msrb.mxu0 %v403_v17  ;;  %672 = vmatpush.msrb.mxu1 %v437_v18  ;;  %v165_v49 = vrot.slane %v164_v34, 2  ;;  %v237_v63 = vrot.slane %v236_v48, 1 }
  0x5c   :  { %v435_v30 = vld [vmem:[#allocation7 + $0x540] sm:$0xff]  ;;  %v129_v35 = vld [vmem:[#allocation2 + $0x30] sm:$0xff]  ;;  %694 = vmatpush.msrb.mxu2 %v465_v23  ;;  %713 = vmatpush.msrb.mxu3 %v499_v24  ;;  %v216_v51 = vrot.slane %v215_v41, 1  ;;  %v220_v53 = vadd.f32 %v219_v43, %v218_v29  ;;  %v161_v62 = vadd.f32 %v160_v47, %v159_v32  ;;  %v182_v4 = vadd.f32 %v181_v52, %v180_v42  ;;  %v130_v13 = vld [vmem:[#allocation2 + $0x38] sm:$0xff] }
  0x5d   :  { %v137_v36 = vld [vmem:[#allocation2 + $0x70] sm:$0xff]  ;;  %v463_v37 = vld [vmem:[#allocation7 + $0x620] sm:$0xff]  ;;  %v231_v46 = vadd.f32 %v230_v31, %v229_v19  ;;  %654 = vmatpush.msrb.mxu0 %v401_v25  ;;  %673 = vmatpush.msrb.mxu1 %v435_v30  ;;  %v166_v0 = vadd.f32 %v165_v49, %v164_v34  ;;  %v238_v8 = vadd.f32 %v237_v63, %v236_v48  ;;  %v138_v14 = vld [vmem:[#allocation2 + $0x78] sm:$0xff] }
  0x5e   :  { %v497_v38 = vld [vmem:[#allocation7 + $0x730] sm:$0xff]  ;;  %v399_v39 = vld [vmem:[#allocation7 + $0x420] sm:$0xff]  ;;  %v197_v55 = vadd.f32 %v137_v36, %v129_v35  ;;  %695 = vmatpush.msrb.mxu2 %v463_v37  ;;  %v217_v3 = vadd.f32 %v216_v51, %v215_v41  ;;  %v221_v5 = vrot.slane %v220_v53, 2  ;;  %v183_v12 = vadd.f32 %v135_v57, %v127_v56  ;;  %v298_v34 = vld [vmem:[#allocation7 + $0xf8] sm:$0xff] }
  0x5f   :  { %v433_v44 = vld [vmem:[#allocation7 + $0x530] sm:$0xff]  ;;  %v495_v58 = vld [vmem:[#allocation7 + $0x720] sm:$0xff]  ;;  %v1399_v61 = vsel %vm545_vm0, %v231_v46, %v175_v40  ;;  %714 = vmatpush.msrb.mxu3 %v497_v38  ;;  %655 = vmatpush.msrb.mxu0 %v399_v39  ;;  %v167_v9 = vrot.slane %v166_v0, 1  ;;  %v1405_v23 = vsel %vm545_vm0, %v238_v8, %v182_v4  ;;  %v204_v31 = vadd.f32 %v138_v14, %v130_v13  ;;  %v360_v38 = vld [vmem:[#allocation7 + $0x2e8] sm:$0xff] }
  0x60   :  { %v461_v45 = vld [vmem:[#allocation7 + $0x610] sm:$0xff]  ;;  %v431_v60 = vld [vmem:[#allocation7 + $0x520] sm:$0xff]  ;;  %v198_v6 = vrot.slane %v197_v55, 4  ;;  %674 = vmatpush.msrb.mxu1 %v433_v44  ;;  %v1402_v16 = vsel %vm545_vm0, %v217_v3, %v161_v62  ;;  %v222_v17 = vadd.f32 %v221_v5, %v220_v53  ;;  %v184_v26 = vrot.slane %v183_v12, 4  ;;  %618 = vmatmul.f32.vlgmr.msra.gmra.mxu2 %v1399_v61  ;;  %v394_v39 = vld [vmem:[#allocation7 + $0x3f8] sm:$0xff] }
  0x61   :  { %v145_v50 = vld [vmem:[#allocation2 + $0xb0] sm:$0xff]  ;;  %v459_v1 = vld [vmem:[#allocation7 + $0x600] sm:$0xff]  ;;  %696 = vmatpush.msrb.mxu2 %v461_v45  ;;  %715 = vmatpush.msrb.mxu3 %v495_v58  ;;  %v146_v19 = vld [vmem:[#allocation2 + $0xb8] sm:$0xff]  ;;  %v168_v24 = vadd.f32 %v167_v9, %v166_v0  ;;  %v205_v44 = vrot.slane %v204_v31, 4 }
  0x62   :  { %v153_v54 = vld [vmem:[#allocation2 + $0xf0] sm:$0xff]  ;;  %v143_v7 = vld [vmem:[#allocation2 + $0xa0] sm:$0xff]  ;;  %v199_v18 = vadd.f32 %v198_v6, %v197_v55  ;;  %v154_v20 = vld [vmem:[#allocation2 + $0xf8] sm:$0xff]  ;;  %675 = vmatpush.msrb.mxu1 %v431_v60  ;;  %v223_v28 = vrot.slane %v222_v17, 1  ;;  %v185_v36 = vadd.f32 %v184_v26, %v183_v12  ;;  %578 = vmatmul.f32.vlgmr.msra.gmra.mxu0 %v1402_v16 }
  0x63   :  { %v397_v59 = vld [vmem:[#allocation7 + $0x410] sm:$0xff]  ;;  %v253_v10 = vadd.f32 %v153_v54, %v145_v50  ;;  %v151_v11 = vld [vmem:[#allocation2 + $0xe0] sm:$0xff]  ;;  %697 = vmatpush.msrb.mxu2 %v459_v1  ;;  %v128_v32 = vld [vmem:[#allocation2 + $0x28] sm:$0xff]  ;;  %v260_v37 = vadd.f32 %v154_v20, %v146_v19  ;;  %638 = vmatmul.f32.vlgmr.msra.gmra.mxu3 %v1405_v23  ;;  %v206_v56 = vadd.f32 %v205_v44, %v204_v31 }
  0x64   :  { %v493_v2 = vld [vmem:[#allocation7 + $0x710] sm:$0xff]  ;;  %v395_v15 = vld [vmem:[#allocation7 + $0x400] sm:$0xff]  ;;  %656 = vmatpush.msrb.mxu0 %v397_v59  ;;  %v200_v29 = vrot.slane %v199_v18, 2  ;;  %v239_v30 = vadd.f32 %v151_v11, %v143_v7  ;;  %v224_v41 = vadd.f32 %v223_v28, %v222_v17  ;;  %v296_v45 = vld [vmem:[#allocation7 + $0xe8] sm:$0xff]  ;;  %v186_v47 = vrot.slane %v185_v36, 2 }
  0x65   :  { %v429_v22 = vld [vmem:[#allocation7 + $0x510] sm:$0xff]  ;;  %v254_v25 = vrot.slane %v253_v10, 4  ;;  %716 = vmatpush.msrb.mxu3 %v493_v2  ;;  %v491_v27 = vld [vmem:[#allocation7 + $0x700] sm:$0xff]  ;;  %762 = vmatpush.msra.mxu2 %v362_v21  ;;  %v261_v48 = vrot.slane %v260_v37, 4  ;;  %v358_v53 = vld [vmem:[#allocation7 + $0x2d8] sm:$0xff]  ;;  %v207_v4 = vrot.slane %v206_v56, 2 }
  0x66   :  { %v136_v33 = vld [vmem:[#allocation2 + $0x68] sm:$0xff]  ;;  %657 = vmatpush.msrb.mxu0 %v395_v15  ;;  %676 = vmatpush.msrb.mxu1 %v429_v22  ;;  %v201_v42 = vadd.f32 %v200_v29, %v199_v18  ;;  %v240_v43 = vrot.slane %v239_v30, 4  ;;  %v1411_v52 = vsel %vm545_vm0, %v224_v41, %v168_v24  ;;  %v330_v57 = vld [vmem:[#allocation7 + $0x1f8] sm:$0xff]  ;;  %v187_v60 = vadd.f32 %v186_v47, %v185_v36 }
  0x67   :  { %v255_v35 = vadd.f32 %v254_v25, %v253_v10  ;;  %v427_v40 = vld [vmem:[#allocation7 + $0x500] sm:$0xff]  ;;  %717 = vmatpush.msrb.mxu3 %v491_v27  ;;  %v190_v51 = vadd.f32 %v136_v33, %v128_v32  ;;  %763 = vmatpush.msra.mxu2 %v360_v38  ;;  %v392_v58 = vld [vmem:[#allocation7 + $0x3e8] sm:$0xff]  ;;  %v262_v62 = vadd.f32 %v261_v48, %v260_v37  ;;  %v294_v0 = vld [vmem:[#allocation7 + $0xd8] sm:$0xff] }
  0x68   :  { %v144_v49 = vld [vmem:[#allocation2 + $0xa8] sm:$0xff]  ;;  %722 = vmatpush.msra.mxu0 %v298_v34  ;;  %v202_v54 = vrot.slane %v201_v42, 1  ;;  %v241_v55 = vadd.f32 %v240_v43, %v239_v30  ;;  %677 = vmatpush.msrb.mxu1 %v427_v40  ;;  %v390_v7 = vld [vmem:[#allocation7 + $0x3d8] sm:$0xff]  ;;  %v188_v9 = vrot.slane %v187_v60, 1  ;;  %v208_v15 = vadd.f32 %v207_v4, %v206_v56 }
  0x69   :  { %v256_v46 = vrot.slane %v255_v35, 2  ;;  %v152_v50 = vld [vmem:[#allocation2 + $0xe8] sm:$0xff]  ;;  %782 = vmatpush.msra.mxu3 %v394_v39  ;;  %v191_v63 = vrot.slane %v190_v51, 4  ;;  %598 = vmatmul.f32.vlgmr.msra.gmra.mxu1 %v1411_v52  ;;  %v263_v10 = vrot.slane %v262_v62, 2  ;;  %v354_v13 = vld [vmem:[#allocation7 + $0x2b8] sm:$0xff] }
  0x6a   :  { %723 = vmatpush.msra.mxu0 %v296_v45  ;;  %v356_v1 = vld [vmem:[#allocation7 + $0x2c8] sm:$0xff]  ;;  %v203_v2 = vadd.f32 %v202_v54, %v201_v42  ;;  %v242_v3 = vrot.slane %v241_v55, 2  ;;  %v246_v5 = vadd.f32 %v152_v50, %v144_v49  ;;  %764 = vmatpush.msra.mxu2 %v358_v53  ;;  %v326_v19 = vld [vmem:[#allocation7 + $0x1d8] sm:$0xff]  ;;  %v189_v24 = vadd.f32 %v188_v9, %v187_v60 }
  0x6b   :  { %v257_v59 = vadd.f32 %v256_v46, %v255_v35  ;;  %v328_v6 = vld [vmem:[#allocation7 + $0x1e8] sm:$0xff]  ;;  %v192_v11 = vadd.f32 %v191_v63, %v190_v51  ;;  %742 = vmatpush.msra.mxu1 %v330_v57  ;;  %783 = vmatpush.msra.mxu3 %v392_v58  ;;  %v264_v20 = vadd.f32 %v263_v10, %v262_v62  ;;  %v209_v26 = vrot.slane %v208_v15, 1  ;;  %v290_v27 = vld [vmem:[#allocation7 + $0xb8] sm:$0xff] }
  0x6c   :  { %v292_v12 = vld [vmem:[#allocation7 + $0xc8] sm:$0xff]  ;;  %v243_v14 = vadd.f32 %v242_v3, %v241_v55  ;;  %v247_v17 = vrot.slane %v246_v5, 4  ;;  %724 = vmatpush.msra.mxu0 %v294_v0  ;;  %765 = vmatpush.msra.mxu2 %v356_v1  ;;  %v386_v36 = vld [vmem:[#allocation7 + $0x3b8] sm:$0xff] }
  0x6d   :  { %v258_v8 = vrot.slane %v257_v59, 1  ;;  %v193_v21 = vrot.slane %v192_v11, 2  ;;  %743 = vmatpush.msra.mxu1 %v328_v6  ;;  %784 = vmatpush.msra.mxu3 %v390_v7  ;;  %v388_v22 = vld [vmem:[#allocation7 + $0x3c8] sm:$0xff]  ;;  %v265_v30 = vrot.slane %v264_v20, 1  ;;  %v210_v35 = vadd.f32 %v209_v26, %v208_v15  ;;  %v322_v43 = vld [vmem:[#allocation7 + $0x1b8] sm:$0xff] }
  0x6e   :  { %v244_v25 = vrot.slane %v243_v14, 1  ;;  %v248_v28 = vadd.f32 %v247_v17, %v246_v5  ;;  %725 = vmatpush.msra.mxu0 %v292_v12  ;;  %766 = vmatpush.msra.mxu2 %v354_v13  ;;  %v324_v31 = vld [vmem:[#allocation7 + $0x1c8] sm:$0xff]  ;;  %v350_v44 = vld [vmem:[#allocation7 + $0x298] sm:$0xff] }
  0x6f   :  { %v259_v18 = vadd.f32 %v258_v8, %v257_v59  ;;  %v352_v32 = vld [vmem:[#allocation7 + $0x2a8] sm:$0xff]  ;;  %v194_v33 = vadd.f32 %v193_v21, %v192_v11  ;;  %744 = vmatpush.msra.mxu1 %v326_v19  ;;  %785 = vmatpush.msra.mxu3 %v388_v22  ;;  %v266_v38 = vadd.f32 %v265_v30, %v264_v20  ;;  %v286_v47 = vld [vmem:[#allocation7 + $0x98] sm:$0xff] }
  0x70   :  { %v245_v34 = vadd.f32 %v244_v25, %v243_v14  ;;  %v249_v37 = vrot.slane %v248_v28, 2  ;;  %726 = vmatpush.msra.mxu0 %v290_v27  ;;  %v288_v40 = vld [vmem:[#allocation7 + $0xa8] sm:$0xff]  ;;  %767 = vmatpush.msra.mxu2 %v352_v32  ;;  %v382_v53 = vld [vmem:[#allocation7 + $0x398] sm:$0xff] }
  0x71   :  { %v1415_v29 = vsel %vm545_vm0, %v259_v18, %v203_v2  ;;  %v195_v39 = vrot.slane %v194_v33, 1  ;;  %745 = vmatpush.msra.mxu1 %v324_v31  ;;  %v1423_v45 = vsel %vm545_vm0, %v266_v38, %v210_v35  ;;  %786 = vmatpush.msra.mxu3 %v386_v36  ;;  %v384_v46 = vld [vmem:[#allocation7 + $0x3a8] sm:$0xff]  ;;  %v346_v56 = vld [vmem:[#allocation7 + $0x278] sm:$0xff] }
  0x72   :  { %698 = vmatmul.f32.vlgmr.msrb.gmra.mxu2 %v1415_v29  ;;  %v1419_v41 = vsel %vm545_vm0, %v245_v34, %v189_v24  ;;  %v250_v42 = vadd.f32 %v249_v37, %v248_v28  ;;  %718 = vmatmul.f32.vlgmr.msrb.gmra.mxu3 %v1423_v45  ;;  %v320_v50 = vld [vmem:[#allocation7 + $0x1a8] sm:$0xff]  ;;  %v318_v57 = vld [vmem:[#allocation7 + $0x198] sm:$0xff] }
  0x73   :  { %658 = vmatmul.f32.vlgmr.msrb.gmra.mxu0 %v1419_v41  ;;  %v196_v48 = vadd.f32 %v195_v39, %v194_v33  ;;  %v348_v51 = vld [vmem:[#allocation7 + $0x288] sm:$0xff]  ;;  %746 = vmatpush.msra.mxu1 %v322_v43  ;;  %v282_v60 = vld [vmem:[#allocation7 + $0x78] sm:$0xff] }
  0x74   :  { %v251_v49 = vrot.slane %v250_v42, 1  ;;  %727 = vmatpush.msra.mxu0 %v288_v40  ;;  %768 = vmatpush.msra.mxu2 %v350_v44  ;;  %v284_v54 = vld [vmem:[#allocation7 + $0x88] sm:$0xff]  ;;  %v378_v0 = vld [vmem:[#allocation7 + $0x378] sm:$0xff] }
  0x75   :  { %787 = vmatpush.msra.mxu3 %v384_v46  ;;  %747 = vmatpush.msra.mxu1 %v320_v50  ;;  %v380_v58 = vld [vmem:[#allocation7 + $0x388] sm:$0xff]  ;;  %v342_v2 = vld [vmem:[#allocation7 + $0x258] sm:$0xff] }
  0x76   :  { %v252_v55 = vadd.f32 %v251_v49, %v250_v42  ;;  %728 = vmatpush.msra.mxu0 %v286_v47  ;;  %769 = vmatpush.msra.mxu2 %v348_v51  ;;  %v344_v62 = vld [vmem:[#allocation7 + $0x268] sm:$0xff]  ;;  %v314_v3 = vld [vmem:[#allocation7 + $0x178] sm:$0xff] }
  0x77   :  { %788 = vmatpush.msra.mxu3 %v382_v53  ;;  %v316_v63 = vld [vmem:[#allocation7 + $0x188] sm:$0xff]  ;;  %748 = vmatpush.msra.mxu1 %v318_v57  ;;  %v278_v5 = vld [vmem:[#allocation7 + $0x58] sm:$0xff] }
  0x78   :  { %v1427_v59 = vsel %vm545_vm0, %v252_v55, %v196_v48  ;;  %729 = vmatpush.msra.mxu0 %v284_v54  ;;  %770 = vmatpush.msra.mxu2 %v346_v56  ;;  %v280_v1 = vld [vmem:[#allocation7 + $0x68] sm:$0xff]  ;;  %v374_v8 = vld [vmem:[#allocation7 + $0x358] sm:$0xff] }
  0x79   :  { %678 = vmatmul.f32.vlgmr.msrb.gmra.mxu1 %v1427_v59  ;;  %789 = vmatpush.msra.mxu3 %v380_v58  ;;  %v376_v4 = vld [vmem:[#allocation7 + $0x368] sm:$0xff]  ;;  %v338_v10 = vld [vmem:[#allocation7 + $0x238] sm:$0xff] }
  0x7a   :  { %730 = vmatpush.msra.mxu0 %v282_v60  ;;  %771 = vmatpush.msra.mxu2 %v344_v62  ;;  %v340_v6 = vld [vmem:[#allocation7 + $0x248] sm:$0xff]  ;;  %v310_v11 = vld [vmem:[#allocation7 + $0x158] sm:$0xff] }
  0x7b   :  { %749 = vmatpush.msra.mxu1 %v316_v63  ;;  %790 = vmatpush.msra.mxu3 %v378_v0  ;;  %v312_v7 = vld [vmem:[#allocation7 + $0x168] sm:$0xff]  ;;  %v274_v13 = vld [vmem:[#allocation7 + $0x38] sm:$0xff] }
  0x7c   :  { %731 = vmatpush.msra.mxu0 %v280_v1  ;;  %772 = vmatpush.msra.mxu2 %v342_v2  ;;  %v276_v9 = vld [vmem:[#allocation7 + $0x48] sm:$0xff]  ;;  %v370_v17 = vld [vmem:[#allocation7 + $0x338] sm:$0xff] }
  0x7d   :  { %750 = vmatpush.msra.mxu1 %v314_v3  ;;  %791 = vmatpush.msra.mxu3 %v376_v4  ;;  %v372_v12 = vld [vmem:[#allocation7 + $0x348] sm:$0xff]  ;;  %v334_v19 = vld [vmem:[#allocation7 + $0x218] sm:$0xff] }
  0x7e   :  { %732 = vmatpush.msra.mxu0 %v278_v5  ;;  %773 = vmatpush.msra.mxu2 %v340_v6  ;;  %v336_v14 = vld [vmem:[#allocation7 + $0x228] sm:$0xff]  ;;  %v306_v20 = vld [vmem:[#allocation7 + $0x138] sm:$0xff] }
  0x7f   :  { %751 = vmatpush.msra.mxu1 %v312_v7  ;;  %792 = vmatpush.msra.mxu3 %v374_v8  ;;  %v308_v15 = vld [vmem:[#allocation7 + $0x148] sm:$0xff]  ;;  %v270_v22 = vld [vmem:[#allocation7 + $0x18] sm:$0xff] }
  0x80   :  { %733 = vmatpush.msra.mxu0 %v276_v9  ;;  %774 = vmatpush.msra.mxu2 %v338_v10  ;;  %v272_v18 = vld [vmem:[#allocation7 + $0x28] sm:$0xff]  ;;  %v366_v26 = vld [vmem:[#allocation7 + $0x318] sm:$0xff] }
  0x81   :  { %752 = vmatpush.msra.mxu1 %v310_v11  ;;  %793 = vmatpush.msra.mxu3 %v372_v12  ;;  %v368_v21 = vld [vmem:[#allocation7 + $0x328] sm:$0xff]  ;;  %v490_v27 = vld [vmem:[#allocation7 + $0x6f8] sm:$0xff] }
  0x82   :  { %734 = vmatpush.msra.mxu0 %v274_v13  ;;  %775 = vmatpush.msra.mxu2 %v336_v14  ;;  %v332_v24 = vld [vmem:[#allocation7 + $0x208] sm:$0xff]  ;;  %v302_v30 = vld [vmem:[#allocation7 + $0x118] sm:$0xff] }
  0x83   :  { %753 = vmatpush.msra.mxu1 %v308_v15  ;;  %794 = vmatpush.msra.mxu3 %v370_v17  ;;  %v304_v25 = vld [vmem:[#allocation7 + $0x128] sm:$0xff]  ;;  %v426_v32 = vld [vmem:[#allocation7 + $0x4f8] sm:$0xff] }
  0x84   :  { %735 = vmatpush.msra.mxu0 %v272_v18  ;;  %776 = vmatpush.msra.mxu2 %v334_v19  ;;  %v268_v28 = vld [vmem:[#allocation7 + $0x8] sm:$0xff]  ;;  %v522_v34 = vld [vmem:[#allocation7 + $0x7f8] sm:$0xff] }
  0x85   :  { %754 = vmatpush.msra.mxu1 %v306_v20  ;;  %795 = vmatpush.msra.mxu3 %v368_v21  ;;  %v364_v31 = vld [vmem:[#allocation7 + $0x308] sm:$0xff]  ;;  %v458_v37 = vld [vmem:[#allocation7 + $0x5f8] sm:$0xff] }
  0x86   :  { %736 = vmatpush.msra.mxu0 %v270_v22  ;;  %777 = vmatpush.msra.mxu2 %v332_v24  ;;  %v488_v33 = vld [vmem:[#allocation7 + $0x6e8] sm:$0xff]  ;;  %v486_v38 = vld [vmem:[#allocation7 + $0x6d8] sm:$0xff] }
  0x87   :  { %755 = vmatpush.msra.mxu1 %v304_v25  ;;  %796 = vmatpush.msra.mxu3 %v366_v26  ;;  %v300_v35 = vld [vmem:[#allocation7 + $0x108] sm:$0xff]  ;;  %v422_v40 = vld [vmem:[#allocation7 + $0x4d8] sm:$0xff] }
  0x88   :  { %842 = vmatpush.msrb.mxu2 %v490_v27  ;;  %737 = vmatpush.msra.mxu0 %v268_v28  ;;  %v424_v36 = vld [vmem:[#allocation7 + $0x4e8] sm:$0xff]  ;;  %v518_v44 = vld [vmem:[#allocation7 + $0x7d8] sm:$0xff] }
  0x89   :  { %756 = vmatpush.msra.mxu1 %v302_v30  ;;  %797 = vmatpush.msra.mxu3 %v364_v31  ;;  %v520_v39 = vld [vmem:[#allocation7 + $0x7e8] sm:$0xff]  ;;  %v454_v47 = vld [vmem:[#allocation7 + $0x5d8] sm:$0xff] }
  0x8a   :  { %802 = vmatpush.msrb.mxu0 %v426_v32  ;;  %843 = vmatpush.msrb.mxu2 %v488_v33  ;;  %v456_v42 = vld [vmem:[#allocation7 + $0x5e8] sm:$0xff]  ;;  %v482_v48 = vld [vmem:[#allocation7 + $0x6b8] sm:$0xff] }
  0x8b   :  { %862 = vmatpush.msrb.mxu3 %v522_v34  ;;  %757 = vmatpush.msra.mxu1 %v300_v35  ;;  %v484_v43 = vld [vmem:[#allocation7 + $0x6c8] sm:$0xff]  ;;  %v418_v50 = vld [vmem:[#allocation7 + $0x4b8] sm:$0xff] }
  0x8c   :  { %803 = vmatpush.msrb.mxu0 %v424_v36  ;;  %844 = vmatpush.msrb.mxu2 %v486_v38  ;;  %v420_v46 = vld [vmem:[#allocation7 + $0x4c8] sm:$0xff]  ;;  %v514_v54 = vld [vmem:[#allocation7 + $0x7b8] sm:$0xff] }
  0x8d   :  { %822 = vmatpush.msrb.mxu1 %v458_v37  ;;  %863 = vmatpush.msrb.mxu3 %v520_v39  ;;  %v516_v49 = vld [vmem:[#allocation7 + $0x7c8] sm:$0xff]  ;;  %v450_v56 = vld [vmem:[#allocation7 + $0x5b8] sm:$0xff] }
  0x8e   :  { %804 = vmatpush.msrb.mxu0 %v422_v40  ;;  %845 = vmatpush.msrb.mxu2 %v484_v43  ;;  %v452_v51 = vld [vmem:[#allocation7 + $0x5c8] sm:$0xff]  ;;  %v478_v57 = vld [vmem:[#allocation7 + $0x698] sm:$0xff]  ;;  %v955_v40 = vld [vmem:[#allocation8 + $0x70] sm:$0xff] }
  0x8f   :  { %823 = vmatpush.msrb.mxu1 %v456_v42  ;;  %864 = vmatpush.msrb.mxu3 %v518_v44  ;;  %v480_v53 = vld [vmem:[#allocation7 + $0x6a8] sm:$0xff]  ;;  %v414_v60 = vld [vmem:[#allocation7 + $0x498] sm:$0xff] }
  0x90   :  { %805 = vmatpush.msrb.mxu0 %v420_v46  ;;  %846 = vmatpush.msrb.mxu2 %v482_v48  ;;  %v416_v55 = vld [vmem:[#allocation7 + $0x4a8] sm:$0xff]  ;;  %v510_v0 = vld [vmem:[#allocation7 + $0x798] sm:$0xff] }
  0x91   :  { %824 = vmatpush.msrb.mxu1 %v454_v47  ;;  %865 = vmatpush.msrb.mxu3 %v516_v49  ;;  %v512_v58 = vld [vmem:[#allocation7 + $0x7a8] sm:$0xff]  ;;  %v446_v2 = vld [vmem:[#allocation7 + $0x598] sm:$0xff] }
  0x92   :  { %806 = vmatpush.msrb.mxu0 %v418_v50  ;;  %847 = vmatpush.msrb.mxu2 %v480_v53  ;;  %v448_v62 = vld [vmem:[#allocation7 + $0x5a8] sm:$0xff]  ;;  %v474_v3 = vld [vmem:[#allocation7 + $0x678] sm:$0xff]  ;;  %v949_v50 = vld [vmem:[#allocation8 + $0x40] sm:$0xff] }
  0x93   :  { %825 = vmatpush.msrb.mxu1 %v452_v51  ;;  %866 = vmatpush.msrb.mxu3 %v514_v54  ;;  %v476_v63 = vld [vmem:[#allocation7 + $0x688] sm:$0xff]  ;;  %v410_v5 = vld [vmem:[#allocation7 + $0x478] sm:$0xff]  ;;  %v947_v53 = vld [vmem:[#allocation8 + $0x30] sm:$0xff] }
  0x94   :  { %807 = vmatpush.msrb.mxu0 %v416_v55  ;;  %848 = vmatpush.msrb.mxu2 %v478_v57  ;;  %v412_v1 = vld [vmem:[#allocation7 + $0x488] sm:$0xff]  ;;  %v506_v8 = vld [vmem:[#allocation7 + $0x778] sm:$0xff]  ;;  %v945_v55 = vld [vmem:[#allocation8 + $0x20] sm:$0xff] }
  0x95   :  { %826 = vmatpush.msrb.mxu1 %v450_v56  ;;  %867 = vmatpush.msrb.mxu3 %v512_v58  ;;  %v508_v4 = vld [vmem:[#allocation7 + $0x788] sm:$0xff]  ;;  %v442_v10 = vld [vmem:[#allocation7 + $0x578] sm:$0xff]  ;;  %v943_v57 = vld [vmem:[#allocation8 + $0x10] sm:$0xff] }
  0x96   :  { %808 = vmatpush.msrb.mxu0 %v414_v60  ;;  %849 = vmatpush.msrb.mxu2 %v476_v63  ;;  %v444_v6 = vld [vmem:[#allocation7 + $0x588] sm:$0xff]  ;;  %v470_v11 = vld [vmem:[#allocation7 + $0x658] sm:$0xff]  ;;  %v941_v60 = vld [vmem:[#allocation8] sm:$0xff] }
  0x97   :  { %827 = vmatpush.msrb.mxu1 %v448_v62  ;;  %868 = vmatpush.msrb.mxu3 %v510_v0  ;;  %v472_v7 = vld [vmem:[#allocation7 + $0x668] sm:$0xff]  ;;  %v406_v13 = vld [vmem:[#allocation7 + $0x458] sm:$0xff]  ;;  %v971_v63 = vld [vmem:[#allocation8 + $0xf0] sm:$0xff] }
  0x98   :  { %809 = vmatpush.msrb.mxu0 %v412_v1  ;;  %850 = vmatpush.msrb.mxu2 %v474_v3  ;;  %v408_v9 = vld [vmem:[#allocation7 + $0x468] sm:$0xff]  ;;  %v502_v17 = vld [vmem:[#allocation7 + $0x758] sm:$0xff]  ;;  %v969_v3 = vld [vmem:[#allocation8 + $0xe0] sm:$0xff] }
  0x99   :  { %828 = vmatpush.msrb.mxu1 %v446_v2  ;;  %869 = vmatpush.msrb.mxu3 %v508_v4  ;;  %v504_v12 = vld [vmem:[#allocation7 + $0x768] sm:$0xff]  ;;  %v438_v19 = vld [vmem:[#allocation7 + $0x558] sm:$0xff] }
  0x9a   :  { %810 = vmatpush.msrb.mxu0 %v410_v5  ;;  %851 = vmatpush.msrb.mxu2 %v472_v7  ;;  %v440_v14 = vld [vmem:[#allocation7 + $0x568] sm:$0xff]  ;;  %v466_v20 = vld [vmem:[#allocation7 + $0x638] sm:$0xff]  ;;  %v967_v7 = vld [vmem:[#allocation8 + $0xd0] sm:$0xff] }
  0x9b   :  { %829 = vmatpush.msrb.mxu1 %v444_v6  ;;  %870 = vmatpush.msrb.mxu3 %v506_v8  ;;  %v468_v15 = vld [vmem:[#allocation7 + $0x648] sm:$0xff]  ;;  %v402_v22 = vld [vmem:[#allocation7 + $0x438] sm:$0xff] }
  0x9c   :  { %811 = vmatpush.msrb.mxu0 %v408_v9  ;;  %852 = vmatpush.msrb.mxu2 %v470_v11  ;;  %v404_v18 = vld [vmem:[#allocation7 + $0x448] sm:$0xff]  ;;  %v498_v26 = vld [vmem:[#allocation7 + $0x738] sm:$0xff] }
  0x9d   :  { %830 = vmatpush.msrb.mxu1 %v442_v10  ;;  %871 = vmatpush.msrb.mxu3 %v504_v12  ;;  %v500_v21 = vld [vmem:[#allocation7 + $0x748] sm:$0xff]  ;;  %v434_v28 = vld [vmem:[#allocation7 + $0x538] sm:$0xff] }
  0x9e   :  { %812 = vmatpush.msrb.mxu0 %v406_v13  ;;  %853 = vmatpush.msrb.mxu2 %v468_v15  ;;  %v436_v24 = vld [vmem:[#allocation7 + $0x548] sm:$0xff]  ;;  %v462_v30 = vld [vmem:[#allocation7 + $0x618] sm:$0xff] }
  0x9f   :  { %831 = vmatpush.msrb.mxu1 %v440_v14  ;;  %872 = vmatpush.msrb.mxu3 %v502_v17  ;;  %v464_v25 = vld [vmem:[#allocation7 + $0x628] sm:$0xff]  ;;  %v494_v34 = vld [vmem:[#allocation7 + $0x718] sm:$0xff] }
  0xa0   :  { %778 = vmatmul.f32.vlgmr.msra.gmra.mxu2 %v1399_v61  ;;  %813 = vmatpush.msrb.mxu0 %v404_v18  ;;  %v400_v27 = vld [vmem:[#allocation7 + $0x428] sm:$0xff]  ;;  %v398_v61 = vld [vmem:[#allocation7 + $0x418] sm:$0xff] }
  0xa1   :  { %832 = vmatpush.msrb.mxu1 %v438_v19  ;;  %854 = vmatpush.msrb.mxu2 %v466_v20  ;;  %v496_v31 = vld [vmem:[#allocation7 + $0x728] sm:$0xff]  ;;  %v956_v37 = vld [vmem:[#allocation8 + $0x78] sm:$0xff] }
  0xa2   :  { %873 = vmatpush.msrb.mxu3 %v500_v21  ;;  %738 = vmatmul.f32.vlgmr.msra.gmra.mxu0 %v1402_v16  ;;  %v432_v32 = vld [vmem:[#allocation7 + $0x528] sm:$0xff]  ;;  %v889_v39 = vld [vmem:[#allocation11 + $0x38] sm:$0xff]  ;;  %v884_v42 = vld [vmem:[#allocation11 + $0x10] sm:$0xff] }
  0xa3   :  { %798 = vmatmul.f32.vlgmr.msra.gmra.mxu3 %v1405_v23  ;;  %814 = vmatpush.msrb.mxu0 %v402_v22  ;;  %v460_v33 = vld [vmem:[#allocation7 + $0x608] sm:$0xff]  ;;  %v430_v23 = vld [vmem:[#allocation7 + $0x518] sm:$0xff] }
  0xa4   :  { %833 = vmatpush.msrb.mxu1 %v436_v24  ;;  %855 = vmatpush.msrb.mxu2 %v464_v25  ;;  %v396_v16 = vld [vmem:[#allocation7 + $0x408] sm:$0xff]  ;;  %v885_v46 = vld [vmem:[#allocation11 + $0x18] sm:$0xff] }
  0xa5   :  { %874 = vmatpush.msrb.mxu3 %v498_v26  ;;  %758 = vmatmul.f32.vlgmr.msra.gmra.mxu1 %v1411_v52  ;;  %v492_v35 = vld [vmem:[#allocation7 + $0x708] sm:$0xff]  ;;  %v888_v52 = vld [vmem:[#allocation11 + $0x30] sm:$0xff]  ;;  %v1441_v0 = vld [vmem:[%s1457_s3] sm:$0x3] }
  0xa6   :  { %815 = vmatpush.msrb.mxu0 %v400_v27  ;;  %834 = vmatpush.msrb.mxu1 %v434_v28  ;;  %v428_v36 = vld [vmem:[#allocation7 + $0x508] sm:$0xff]  ;;  %v952_v48 = vld [vmem:[#allocation8 + $0x58] sm:$0xff]  ;;  %v525_v2 = vperm.slane %v1441_v0, 0  ;;  %v965_v25 = vld [vmem:[#allocation8 + $0xc0] sm:$0xff] }
  0xa7   :  { %856 = vmatpush.msrb.mxu2 %v462_v30  ;;  %875 = vmatpush.msrb.mxu3 %v496_v31  ;;  %v886_v38 = vld [vmem:[#allocation11 + $0x20] sm:$0xff]  ;;  %v887_v43 = vld [vmem:[#allocation11 + $0x28] sm:$0xff]  ;;  %v948_v51 = vld [vmem:[#allocation8 + $0x38] sm:$0xff] }
  0xa8   :  { %816 = vmatpush.msrb.mxu0 %v398_v61  ;;  %835 = vmatpush.msrb.mxu1 %v432_v32  ;;  %v882_v44 = vld [vmem:[#allocation11] sm:$0xff]  ;;  %v883_v47 = vld [vmem:[#allocation11 + $0x8] sm:$0xff]  ;;  %v944_v56 = vld [vmem:[#allocation8 + $0x18] sm:$0xff] }
  0xa9   :  { %857 = vmatpush.msrb.mxu2 %v460_v33  ;;  %876 = vmatpush.msrb.mxu3 %v494_v34  ;;  %v950_v49 = vld [vmem:[#allocation8 + $0x48] sm:$0xff]  ;;  %v972_v62 = vld [vmem:[#allocation8 + $0xf8] sm:$0xff]  ;;  %v963_v27 = vld [vmem:[#allocation8 + $0xb0] sm:$0xff]  ;;  %v526_v34 = vperm.slane %v1441_v0, 1 }
  0xaa   :  { %858 = vmatmul.f32.vlgmr.msrb.gmra.mxu2 %v1415_v29  ;;  %817 = vmatpush.msrb.mxu0 %v396_v16  ;;  %v954_v29 = vld [vmem:[#allocation8 + $0x68] sm:$0xff]  ;;  %v968_v4 = vld [vmem:[#allocation8 + $0xd8] sm:$0xff]  ;;  %v961_v30 = vld [vmem:[#allocation8 + $0xa0] sm:$0xff] }
  0xab   :  { %836 = vmatpush.msrb.mxu1 %v430_v23  ;;  %877 = vmatpush.msrb.mxu3 %v492_v35  ;;  %v946_v54 = vld [vmem:[#allocation8 + $0x28] sm:$0xff]  ;;  %v964_v26 = vld [vmem:[#allocation8 + $0xb8] sm:$0xff]  ;;  %v959_v61 = vld [vmem:[#allocation8 + $0x90] sm:$0xff] }
  0xac   :  { %818 = vmatmul.f32.vlgmr.msrb.gmra.mxu0 %v1419_v41  ;;  %878 = vmatmul.f32.vlgmr.msrb.gmra.mxu3 %v1423_v45  ;;  %v890_v41 = vld [vmem:[#allocation5] sm:$0x3]  ;;  %v953_v45 = vld [vmem:[#allocation8 + $0x60] sm:$0xff]  ;;  %v942_v58 = vld [vmem:[#allocation8 + $0x8] sm:$0xff] }
  0xad   :  { %837 = vmatpush.msrb.mxu1 %v428_v36  ;;  %913 = vmatpush.msra.mxu0 %v888_v52  ;;  %v970_v1 = vld [vmem:[#allocation8 + $0xe8] sm:$0xff]  ;;  %v960_v31 = vld [vmem:[#allocation8 + $0x98] sm:$0xff]  ;;  %v957_v33 = vld [vmem:[#allocation8 + $0x80] sm:$0xff] }
  0xae   :  { %838 = vmatmul.f32.vlgmr.msrb.gmra.mxu1 %v1427_v59  ;;  %977 = vmatpush.msra.mxu2 %v956_v37  ;;  %v951_v59 = vld [vmem:[#allocation8 + $0x50] sm:$0xff]  ;;  %v966_v8 = vld [vmem:[#allocation8 + $0xc8] sm:$0xff] }
  0xaf   :  { %914 = vmatpush.msra.mxu0 %v886_v38  ;;  %933 = vmatpush.msra.mxu1 %v889_v39  ;;  %v962_v28 = vld [vmem:[#allocation8 + $0xa8] sm:$0xff] }
  0xb0   :  { %978 = vmatpush.msra.mxu2 %v955_v40  ;;  %997 = vmatpush.msra.mxu3 %v972_v62  ;;  %v958_v32 = vld [vmem:[#allocation8 + $0x88] sm:$0xff] }
  0xb1   :  { %915 = vmatpush.msra.mxu0 %v884_v42  ;;  %934 = vmatpush.msra.mxu1 %v887_v43 }
  0xb2   :  { %979 = vmatpush.msra.mxu2 %v954_v29  ;;  %998 = vmatpush.msra.mxu3 %v971_v63 }
  0xb3   :  { %916 = vmatpush.msra.mxu0 %v882_v44  ;;  %935 = vmatpush.msra.mxu1 %v885_v46 }
  0xb4   :  { %1095 = vmatmul.msk.f32.vlgmr.msra.gmra.mxu0 %vm897_vm1, %v890_v41  ;;  %980 = vmatpush.msra.mxu2 %v953_v45 }
  0xb5   :  { %936 = vmatpush.msra.mxu1 %v883_v47  ;;  %1018 = vmatpush.msrb.mxu0 %v956_v37 }
  0xb6   :  { %1096 = vmatmul.msk.f32.vlgmr.msra.gmra.mxu1 %vm897_vm1, %v890_v41  ;;  %981 = vmatpush.msra.mxu2 %v952_v48 }
  0xb7   :  { %1019 = vmatpush.msrb.mxu0 %v955_v40  ;;  %1038 = vmatpush.msrb.mxu1 %v972_v62 }
  0xb8   :  { %982 = vmatpush.msra.mxu2 %v951_v59  ;;  %999 = vmatpush.msra.mxu3 %v970_v1 }
  0xb9   :  { %1020 = vmatpush.msrb.mxu0 %v954_v29  ;;  %1039 = vmatpush.msrb.mxu1 %v971_v63  ;;  %v891_v29 = vld [vmem:[%s1461_s7] sm:$0x3] }
  0xba   :  { %983 = vmatpush.msra.mxu2 %v950_v49  ;;  %1000 = vmatpush.msra.mxu3 %v969_v3 }
  0xbb   :  { %1021 = vmatpush.msrb.mxu0 %v953_v45  ;;  %1040 = vmatpush.msrb.mxu1 %v970_v1  ;;  %v893_v45 = vperm.slane %v891_v29, 0 }
  0xbc   :  { %984 = vmatpush.msra.mxu2 %v949_v50  ;;  %1001 = vmatpush.msra.mxu3 %v968_v4 }
  0xbd   :  { %1022 = vmatpush.msrb.mxu0 %v952_v48  ;;  %1041 = vmatpush.msrb.mxu1 %v969_v3 }
  0xbe   :  { %985 = vmatpush.msra.mxu2 %v948_v51  ;;  %1002 = vmatpush.msra.mxu3 %v967_v7 }
  0xbf   :  { %1023 = vmatpush.msrb.mxu0 %v951_v59  ;;  %1042 = vmatpush.msrb.mxu1 %v968_v4  ;;  %v894_v59 = vperm.slane %v891_v29, 1 }
  0xc0   :  { %986 = vmatpush.msra.mxu2 %v947_v53  ;;  %1003 = vmatpush.msra.mxu3 %v966_v8 }
  0xc1   :  { %1024 = vmatpush.msrb.mxu0 %v950_v49  ;;  %1043 = vmatpush.msrb.mxu1 %v967_v7 }
  0xc2   :  { %987 = vmatpush.msra.mxu2 %v946_v54  ;;  %1004 = vmatpush.msra.mxu3 %v965_v25 }
  0xc3   :  { %1025 = vmatpush.msrb.mxu0 %v949_v50  ;;  %1044 = vmatpush.msrb.mxu1 %v966_v8 }
  0xc4   :  { %988 = vmatpush.msra.mxu2 %v945_v55  ;;  %1005 = vmatpush.msra.mxu3 %v964_v26 }
  0xc5   :  { %1026 = vmatpush.msrb.mxu0 %v948_v51  ;;  %1045 = vmatpush.msrb.mxu1 %v965_v25 }
  0xc6   :  { %989 = vmatpush.msra.mxu2 %v944_v56  ;;  %1006 = vmatpush.msra.mxu3 %v963_v27 }
  0xc7   :  { %1027 = vmatpush.msrb.mxu0 %v947_v53  ;;  %1046 = vmatpush.msrb.mxu1 %v964_v26 }
  0xc8   :  { %990 = vmatpush.msra.mxu2 %v943_v57  ;;  %1007 = vmatpush.msra.mxu3 %v962_v28 }
  0xc9   :  { %1028 = vmatpush.msrb.mxu0 %v946_v54  ;;  %1047 = vmatpush.msrb.mxu1 %v963_v27  ;;  %v1111_v54 = vld [vmem:[#allocation10] ss:$0 sm:$0xff] }
  0xca   :  { %991 = vmatpush.msra.mxu2 %v942_v58  ;;  %1008 = vmatpush.msra.mxu3 %v961_v30 }
  0xcb   :  { %1029 = vmatpush.msrb.mxu0 %v945_v55  ;;  %1048 = vmatpush.msrb.mxu1 %v962_v28 }
  0xcc   :  { %992 = vmatpush.msra.mxu2 %v941_v60  ;;  %1009 = vmatpush.msra.mxu3 %v960_v31 }
  0xcd   :  { %1030 = vmatpush.msrb.mxu0 %v944_v56  ;;  %1049 = vmatpush.msrb.mxu1 %v961_v30 }
  0xce   :  { %1010 = vmatpush.msra.mxu3 %v959_v61 }
  0xcf   :  { %1031 = vmatpush.msrb.mxu0 %v943_v57  ;;  %1050 = vmatpush.msrb.mxu1 %v960_v31 }
  0xd0   :  { %1011 = vmatpush.msra.mxu3 %v958_v32 }
  0xd1   :  { %1032 = vmatpush.msrb.mxu0 %v942_v58  ;;  %1051 = vmatpush.msrb.mxu1 %v959_v61 }
  0xd2   :  { %1012 = vmatpush.msra.mxu3 %v957_v33 }
  0xd3   :  { %1033 = vmatpush.msrb.mxu0 %v941_v60  ;;  %1052 = vmatpush.msrb.mxu1 %v958_v32 }
  0xd5   :  { %1053 = vmatpush.msrb.mxu1 %v957_v33 }
  0xdf   :  { %v579_v5 = vpop.f32.mrf.mxu0 }
  0xe0   :  { %v580_v6 = vadd.f32 %v579_v5, %v525_v2 }
  0xe3   :  { %v619_v10 = vpop.f32.mrf.mxu2 }
  0xe6   :  { %v599_v9 = vpop.f32.mrf.mxu1  ;;  %v639_v13 = vpop.f32.mrf.mxu3 }
  0xe7   :  { %v600_v11 = vadd.f32 %v599_v9, %v580_v6 }
  0xe9   :  { %v620_v12 = vadd.f32 %v619_v10, %v600_v11 }
  0xeb   :  { %v640_v14 = vadd.f32 %v639_v13, %v620_v12 }
  0xf0   :  { %v659_v15 = vpop.f32.mrf.mxu0 }
  0xf1   :  { %v660_v17 = vadd.f32 %v659_v15, %v640_v14 }
  0xf5   :  { %v699_v19 = vpop.f32.mrf.mxu2  ;;  %v719_v21 = vpop.f32.mrf.mxu3 }
  0xf6   :  { %v679_v18 = vpop.f32.mrf.mxu1 }
  0xf7   :  { %v680_v20 = vadd.f32 %v679_v18, %v660_v17 }
  0xf9   :  { %v700_v22 = vadd.f32 %v699_v19, %v680_v20 }
  0xfb   :  { %v720_v24 = vadd.f32 %v719_v21, %v700_v22 }
  0xfd   :  { %993 = vmatmul.f32.vlgmr.msra.gmra.mxu2 %v720_v24 }
 0x11f   :  { %v739_v16 = vpop.f32.mrf.mxu0 }
 0x120   :  { %v740_v23 = vadd.f32 %v739_v16, %v526_v34 }
 0x122   :  { %v759_v35 = vpop.f32.mrf.mxu1 }
 0x123   :  { %v760_v36 = vadd.f32 %v759_v35, %v740_v23  ;;  %v779_v52 = vpop.f32.mrf.mxu2 }
 0x125   :  { %v780_v37 = vadd.f32 %v779_v52, %v760_v36 }
 0x126   :  { %v799_v38 = vpop.f32.mrf.mxu3 }
 0x127   :  { %v800_v39 = vadd.f32 %v799_v38, %v780_v37 }
 0x129   :  { %v819_v40 = vpop.f32.mrf.mxu0 }
 0x12a   :  { %v820_v42 = vadd.f32 %v819_v40, %v800_v39 }
 0x12b   :  { %v839_v43 = vpop.f32.mrf.mxu1 }
 0x12c   :  { %v840_v44 = vadd.f32 %v839_v43, %v820_v42 }
 0x12d   :  { %v859_v46 = vpop.f32.mrf.mxu2 }
 0x12e   :  { %v860_v41 = vadd.f32 %v859_v46, %v840_v44 }
 0x12f   :  { %v879_v47 = vpop.f32.mrf.mxu3 }
 0x130   :  { %v880_v48 = vadd.f32 %v879_v47, %v860_v41 }
 0x131   :  { %v918_v49 = vpop.f32.mrf.mxu0 }
 0x132   :  { %1013 = vmatmul.f32.vlgmr.msra.gmra.mxu3 %v880_v48  ;;  %v919_v50 = vadd.f32 %v918_v49, %v893_v45 }
 0x133   :  { %v938_v51 = vpop.f32.mrf.mxu1 }
 0x134   :  { %v939_v53 = vadd.f32 %v938_v51, %v894_v59  ;;  %1034 = vmatmul.f32.vlgmr.msrb.gmra.mxu0 %v919_v50 }
 0x136   :  { %1054 = vmatmul.f32.vlgmr.msrb.gmra.mxu1 %v939_v53 }
 0x180   :  { %v994_v55 = vpop.f32.mrf.mxu2 }
 0x181   :  { %v995_v60 = vadd.f32 %v1111_v54, %v994_v55 }
 0x1b1   :  { %v1035_v56 = vpop.f32.mrf.mxu0 }
 0x1b2   :  { %v1036_v57 = vadd.f32 %v1111_v54, %v1035_v56 }
 0x1b3   :  { %v1055_v58 = vpop.f32.mrf.mxu1 }
 0x1b4   :  { %v1056_v62 = vadd.f32 %v1055_v58, %v1036_v57 }
 0x1b5   :  { %v1014_v63 = vpop.f32.mrf.mxu3 }
 0x1b6   :  { %v1015_v0 = vadd.f32 %v1014_v63, %v995_v60  ;;  %1058 = vst [vmem:[#allocation14] sm:$0x3] %v1056_v62 }
 0x1b7   :  { %1080 = dma.vmem_to_hbm [thread:$0]  %s1076_s22, 32, %s1078_s23, [#allocation15]  }
 0x1b8   :  { %1017 = vst [vmem:[#allocation13] sm:$0x3] %v1015_v0 }
 0x1b9   :  { %1069 = dma.vmem_to_hbm [thread:$0]  %s1065_s25, 32, %s1067_s27, [#allocation4]  }
 0x1ba   :  { %1312 = dma.done.wait [#allocation4], 32  }
 0x1bb   :  { %1313 = vsyncadd [#allocation4], 4294967264 }
 0x1bc   :  { %1314 = dma.done.wait [#allocation15], 32  }
 0x1bd   :  { %1315 = vsyncadd [#allocation15], 4294967264 }
 0x1be   :  { %1089 = vsyncpa [#allocation3], 1 }
 0x1bf   :  { %1090 = vsyncpa [#allocation6], 1 }
 0x1c0   :  { %1091 = vsyncpa [#allocation9], 1 }
 0x1c1   :  { %1092 = vsyncpa [#allocation12], 1 }
 0x1c2   :  { %1093 = vsyncpa [#allocation4], 1 }
 0x1c3   :  { %1094 = vsyncpa [#allocation15], 1 }

</bundles_post_ra>
